<compile_context>
chip_gen: v6e
topology: v6e:2x2x1
jax: 0.10.0
libtpu: 0.0.40
codegen_flags: <defaults>
</compile_context>

<pallas_src>
import jax
import jax.numpy as jnp
from jax import lax
from jax.experimental import pallas as pl
from jax.experimental.pallas import tpu as pltpu


def _conv_add_kernel(x_ref, w_ref, b_ref, other_ref, out_ref):
    """Fused 3x3 conv (stride 1) + bias + elementwise add, one batch element per grid step.

    x_ref:     (1, Hp, Wp, Cin)       spatially pre-padded input, channels-last
    w_ref:     (KH, KW, Cin, Cout)    conv weights (HWIO)
    b_ref:     (Cout, 1)              bias
    other_ref: (1, Cout, Hout*Wout)   lane-dense add operand (flattened NCHW)
    out_ref:   (1, Cout, Hout*Wout)   lane-dense output (flattened NCHW)
    """
    KH, KW, Cin, Cout = w_ref.shape
    _, Hp, Wp, _ = x_ref.shape
    Hout = Hp - KH + 1
    Wout = Wp - KW + 1
    HW = Hout * Wout

    # Whole-image f32 accumulator; 9 static taps -> 9 (HW, Cin) x (Cin, Cout) MXU matmuls.
    acc = jnp.zeros((HW, Cout), dtype=jnp.float32)
    for kh in range(KH):
        for kw in range(KW):
            # Static slice of the padded image for this tap (no dynamic per-row slicing).
            patch = x_ref[0, kh:kh + Hout, kw:kw + Wout, :]          # (Hout, Wout, Cin)
            acc = acc + jnp.dot(patch.reshape(HW, Cin), w_ref[kh, kw],
                                preferred_element_type=jnp.float32)

    # Single transpose to the lane-dense (Cout, HW) layout; bias + other added once.
    res = acc.T + b_ref[...] + other_ref[0].astype(jnp.float32)      # (Cout, HW)
    out_ref[0] = res.astype(out_ref.dtype)


def conv2d_add(x_nchw, w_oihw, bias, other_nchw=None, *, padding=2):
    """Equivalent of: Conv2d(Cin, Cout, K, stride=1, padding=padding)(x) + other."""
    N, Cin, H, W = x_nchw.shape
    Cout, _, KH, KW = w_oihw.shape
    Hout = H + 2 * padding - KH + 1
    Wout = W + 2 * padding - KW + 1
    HW = Hout * Wout

    if other_nchw is None:  # mirrors the `if other is None` branch of the module
        other_nchw = jax.random.normal(jax.random.PRNGKey(0), (N, Cout, Hout, Wout),
                                       dtype=x_nchw.dtype)

    # Input glue: one fused NCHW -> NHWC transpose + zero-pad (channels-last for the MXU).
    x = jnp.transpose(x_nchw, (0, 2, 3, 1))
    x = jnp.pad(x, ((0, 0), (padding, padding), (padding, padding), (0, 0)))
    w = jnp.transpose(w_oihw, (2, 3, 1, 0))            # (KH, KW, Cin, Cout), tiny
    b2 = bias.reshape(Cout, 1)
    other_flat = other_nchw.reshape(N, Cout, HW)       # free reshape (already lane-dense)

    Hp, Wp = H + 2 * padding, W + 2 * padding

    out_flat = pl.pallas_call(
        _conv_add_kernel,
        out_shape=jax.ShapeDtypeStruct((N, Cout, HW), x_nchw.dtype),
        grid=(N,),
        in_specs=[
            pl.BlockSpec((1, Hp, Wp, Cin), lambda n: (n, 0, 0, 0)),
            pl.BlockSpec((KH, KW, Cin, Cout), lambda n: (0, 0, 0, 0)),
            pl.BlockSpec((Cout, 1), lambda n: (0, 0)),
            pl.BlockSpec((1, Cout, HW), lambda n: (n, 0, 0)),
        ],
        out_specs=pl.BlockSpec((1, Cout, HW), lambda n: (n, 0, 0)),
        compiler_params=pltpu.CompilerParams(dimension_semantics=("parallel",)),
    )(x, w, b2, other_flat)

    return out_flat.reshape(N, Cout, Hout, Wout)       # free reshape back to NCHW


if __name__ == "__main__":
    key = jax.random.PRNGKey(0)
    k_x, k_o, k_w, k_b = jax.random.split(key, 4)

    # Conv2d(48, 2, 3, stride=1, padding=2).  Small spatial size chosen so the
    # conv output is (16, 16) -> sublane/lane friendly and Hout*Wout = 256 lanes.
    N, Cin, H, W = 2, 48, 14, 14
    Cout, K, pad = 2, 3, 2
    Hout, Wout = H + 2 * pad - K + 1, W + 2 * pad - K + 1   # 16, 16

    x1 = jax.random.normal(k_x, (N, Cin, H, W), dtype=jnp.float32)
    other = jax.random.normal(k_o, (N, Cout, Hout, Wout), dtype=jnp.float32)

    # Deterministic parameter init (PyTorch-style uniform(-1/sqrt(fan_in), 1/sqrt(fan_in))).
    fan_in = Cin * K * K
    bound = 1.0 / jnp.sqrt(jnp.float32(fan_in))
    w = jax.random.uniform(k_w, (Cout, Cin, K, K), dtype=jnp.float32,
                           minval=-bound, maxval=bound)
    b = jax.random.uniform(k_b, (Cout,), dtype=jnp.float32, minval=-bound, maxval=bound)

    out = conv2d_add(x1, w, b, other, padding=pad)
    out = jax.block_until_ready(out)

    # Pure-JAX reference check.
    ref = lax.conv_general_dilated(
        x1, w, window_strides=(1, 1), padding=((pad, pad), (pad, pad)),
        dimension_numbers=("NCHW", "OIHW", "NCHW"),
    ) + b.reshape(1, Cout, 1, 1) + other

    assert out.shape == (N, Cout, Hout, Wout), out.shape
    assert jnp.allclose(out, ref, rtol=1e-4, atol=1e-4), \
        float(jnp.max(jnp.abs(out - ref)))

    print("KERNEL_OK")
</pallas_src>

<mosaic_0001>
module attributes {stable_mosaic.version = 11 : i64} {
  func.func @_conv_add_kernel(%arg0: i32, %arg1: memref<1x18x18x48xf32, #tpu.memory_space<vmem>>, %arg2: memref<3x3x48x2xf32, #tpu.memory_space<vmem>>, %arg3: memref<2x1xf32, #tpu.memory_space<vmem>>, %arg4: memref<1x2x256xf32, #tpu.memory_space<vmem>>, %arg5: memref<1x2x256xf32, #tpu.memory_space<vmem>>) attributes {dimension_semantics = [#tpu.dimension_semantics<parallel>], iteration_bounds = array<i64: 2>, scalar_prefetch = 0 : i64, scratch_operands = 0 : i64, tpu.core_type = #tpu.core_type<tc>, window_params = [{transform_indices = @transform_0, window_bounds = array<i64: 1, 18, 18, 48>}, {pipeline_mode = #tpu.pipeline_mode<synchronous>, transform_indices = @transform_1, window_bounds = array<i64: 3, 3, 48, 2>}, {pipeline_mode = #tpu.pipeline_mode<synchronous>, transform_indices = @transform_2, window_bounds = array<i64: 2, 1>}, {transform_indices = @transform_3, window_bounds = array<i64: 1, 2, 256>}, {transform_indices = @transform_4, window_bounds = array<i64: 1, 2, 256>}]} {
    %cst = arith.constant 0.000000e+00 : f32
    %0 = vector.broadcast %cst : f32 to vector<256x2xf32>
    %c0 = arith.constant 0 : index
    %c0_0 = arith.constant 0 : index
    %c0_1 = arith.constant 0 : index
    %c0_2 = arith.constant 0 : index
    %1 = vector.load %arg1[%c0, %c0_0, %c0_1, %c0_2] : memref<1x18x18x48xf32, #tpu.memory_space<vmem>>, vector<1x16x16x48xf32>
    %2 = vector.shape_cast %1 : vector<1x16x16x48xf32> to vector<16x16x48xf32>
    %3 = vector.shape_cast %2 : vector<16x16x48xf32> to vector<256x48xf32>
    %c0_3 = arith.constant 0 : index
    %c0_4 = arith.constant 0 : index
    %c0_5 = arith.constant 0 : index
    %c0_6 = arith.constant 0 : index
    %4 = vector.load %arg2[%c0_3, %c0_4, %c0_5, %c0_6] : memref<3x3x48x2xf32, #tpu.memory_space<vmem>>, vector<1x1x48x2xf32>
    %5 = vector.shape_cast %4 : vector<1x1x48x2xf32> to vector<48x2xf32>
    %cst_7 = arith.constant dense<0.000000e+00> : vector<256x2xf32>
    %6 = tpu.matmul %3, %5, %cst_7 {dimension_numbers = #tpu.dot_dimension_numbers<[1], [0], [0], [1], [0, 0, 1, 1], [], []>} : vector<256x48xf32>, vector<48x2xf32>, vector<256x2xf32> -> vector<256x2xf32>
    %7 = arith.addf %0, %6 : vector<256x2xf32>
    %c0_8 = arith.constant 0 : index
    %c0_9 = arith.constant 0 : index
    %c1 = arith.constant 1 : index
    %c0_10 = arith.constant 0 : index
    %8 = vector.load %arg1[%c0_8, %c0_9, %c1, %c0_10] : memref<1x18x18x48xf32, #tpu.memory_space<vmem>>, vector<1x16x16x48xf32>
    %9 = vector.shape_cast %8 : vector<1x16x16x48xf32> to vector<16x16x48xf32>
    %10 = vector.shape_cast %9 : vector<16x16x48xf32> to vector<256x48xf32>
    %c0_11 = arith.constant 0 : index
    %c1_12 = arith.constant 1 : index
    %c0_13 = arith.constant 0 : index
    %c0_14 = arith.constant 0 : index
    %11 = vector.load %arg2[%c0_11, %c1_12, %c0_13, %c0_14] : memref<3x3x48x2xf32, #tpu.memory_space<vmem>>, vector<1x1x48x2xf32>
    %12 = vector.shape_cast %11 : vector<1x1x48x2xf32> to vector<48x2xf32>
    %cst_15 = arith.constant dense<0.000000e+00> : vector<256x2xf32>
    %13 = tpu.matmul %10, %12, %cst_15 {dimension_numbers = #tpu.dot_dimension_numbers<[1], [0], [0], [1], [0, 0, 1, 1], [], []>} : vector<256x48xf32>, vector<48x2xf32>, vector<256x2xf32> -> vector<256x2xf32>
    %14 = arith.addf %7, %13 : vector<256x2xf32>
    %c0_16 = arith.constant 0 : index
    %c0_17 = arith.constant 0 : index
    %c2 = arith.constant 2 : index
    %c0_18 = arith.constant 0 : index
    %15 = vector.load %arg1[%c0_16, %c0_17, %c2, %c0_18] : memref<1x18x18x48xf32, #tpu.memory_space<vmem>>, vector<1x16x16x48xf32>
    %16 = vector.shape_cast %15 : vector<1x16x16x48xf32> to vector<16x16x48xf32>
    %17 = vector.shape_cast %16 : vector<16x16x48xf32> to vector<256x48xf32>
    %c0_19 = arith.constant 0 : index
    %c2_20 = arith.constant 2 : index
    %c0_21 = arith.constant 0 : index
    %c0_22 = arith.constant 0 : index
    %18 = vector.load %arg2[%c0_19, %c2_20, %c0_21, %c0_22] : memref<3x3x48x2xf32, #tpu.memory_space<vmem>>, vector<1x1x48x2xf32>
    %19 = vector.shape_cast %18 : vector<1x1x48x2xf32> to vector<48x2xf32>
    %cst_23 = arith.constant dense<0.000000e+00> : vector<256x2xf32>
    %20 = tpu.matmul %17, %19, %cst_23 {dimension_numbers = #tpu.dot_dimension_numbers<[1], [0], [0], [1], [0, 0, 1, 1], [], []>} : vector<256x48xf32>, vector<48x2xf32>, vector<256x2xf32> -> vector<256x2xf32>
    %21 = arith.addf %14, %20 : vector<256x2xf32>
    %c0_24 = arith.constant 0 : index
    %c1_25 = arith.constant 1 : index
    %c0_26 = arith.constant 0 : index
    %c0_27 = arith.constant 0 : index
    %22 = vector.load %arg1[%c0_24, %c1_25, %c0_26, %c0_27] : memref<1x18x18x48xf32, #tpu.memory_space<vmem>>, vector<1x16x16x48xf32>
    %23 = vector.shape_cast %22 : vector<1x16x16x48xf32> to vector<16x16x48xf32>
    %24 = vector.shape_cast %23 : vector<16x16x48xf32> to vector<256x48xf32>
    %c1_28 = arith.constant 1 : index
    %c0_29 = arith.constant 0 : index
    %c0_30 = arith.constant 0 : index
    %c0_31 = arith.constant 0 : index
    %25 = vector.load %arg2[%c1_28, %c0_29, %c0_30, %c0_31] : memref<3x3x48x2xf32, #tpu.memory_space<vmem>>, vector<1x1x48x2xf32>
    %26 = vector.shape_cast %25 : vector<1x1x48x2xf32> to vector<48x2xf32>
    %cst_32 = arith.constant dense<0.000000e+00> : vector<256x2xf32>
    %27 = tpu.matmul %24, %26, %cst_32 {dimension_numbers = #tpu.dot_dimension_numbers<[1], [0], [0], [1], [0, 0, 1, 1], [], []>} : vector<256x48xf32>, vector<48x2xf32>, vector<256x2xf32> -> vector<256x2xf32>
    %28 = arith.addf %21, %27 : vector<256x2xf32>
    %c0_33 = arith.constant 0 : index
    %c1_34 = arith.constant 1 : index
    %c1_35 = arith.constant 1 : index
    %c0_36 = arith.constant 0 : index
    %29 = vector.load %arg1[%c0_33, %c1_34, %c1_35, %c0_36] : memref<1x18x18x48xf32, #tpu.memory_space<vmem>>, vector<1x16x16x48xf32>
    %30 = vector.shape_cast %29 : vector<1x16x16x48xf32> to vector<16x16x48xf32>
    %31 = vector.shape_cast %30 : vector<16x16x48xf32> to vector<256x48xf32>
    %c1_37 = arith.constant 1 : index
    %c1_38 = arith.constant 1 : index
    %c0_39 = arith.constant 0 : index
    %c0_40 = arith.constant 0 : index
    %32 = vector.load %arg2[%c1_37, %c1_38, %c0_39, %c0_40] : memref<3x3x48x2xf32, #tpu.memory_space<vmem>>, vector<1x1x48x2xf32>
    %33 = vector.shape_cast %32 : vector<1x1x48x2xf32> to vector<48x2xf32>
    %cst_41 = arith.constant dense<0.000000e+00> : vector<256x2xf32>
    %34 = tpu.matmul %31, %33, %cst_41 {dimension_numbers = #tpu.dot_dimension_numbers<[1], [0], [0], [1], [0, 0, 1, 1], [], []>} : vector<256x48xf32>, vector<48x2xf32>, vector<256x2xf32> -> vector<256x2xf32>
    %35 = arith.addf %28, %34 : vector<256x2xf32>
    %c0_42 = arith.constant 0 : index
    %c1_43 = arith.constant 1 : index
    %c2_44 = arith.constant 2 : index
    %c0_45 = arith.constant 0 : index
    %36 = vector.load %arg1[%c0_42, %c1_43, %c2_44, %c0_45] : memref<1x18x18x48xf32, #tpu.memory_space<vmem>>, vector<1x16x16x48xf32>
    %37 = vector.shape_cast %36 : vector<1x16x16x48xf32> to vector<16x16x48xf32>
    %38 = vector.shape_cast %37 : vector<16x16x48xf32> to vector<256x48xf32>
    %c1_46 = arith.constant 1 : index
    %c2_47 = arith.constant 2 : index
    %c0_48 = arith.constant 0 : index
    %c0_49 = arith.constant 0 : index
    %39 = vector.load %arg2[%c1_46, %c2_47, %c0_48, %c0_49] : memref<3x3x48x2xf32, #tpu.memory_space<vmem>>, vector<1x1x48x2xf32>
    %40 = vector.shape_cast %39 : vector<1x1x48x2xf32> to vector<48x2xf32>
    %cst_50 = arith.constant dense<0.000000e+00> : vector<256x2xf32>
    %41 = tpu.matmul %38, %40, %cst_50 {dimension_numbers = #tpu.dot_dimension_numbers<[1], [0], [0], [1], [0, 0, 1, 1], [], []>} : vector<256x48xf32>, vector<48x2xf32>, vector<256x2xf32> -> vector<256x2xf32>
    %42 = arith.addf %35, %41 : vector<256x2xf32>
    %c0_51 = arith.constant 0 : index
    %c2_52 = arith.constant 2 : index
    %c0_53 = arith.constant 0 : index
    %c0_54 = arith.constant 0 : index
    %43 = vector.load %arg1[%c0_51, %c2_52, %c0_53, %c0_54] : memref<1x18x18x48xf32, #tpu.memory_space<vmem>>, vector<1x16x16x48xf32>
    %44 = vector.shape_cast %43 : vector<1x16x16x48xf32> to vector<16x16x48xf32>
    %45 = vector.shape_cast %44 : vector<16x16x48xf32> to vector<256x48xf32>
    %c2_55 = arith.constant 2 : index
    %c0_56 = arith.constant 0 : index
    %c0_57 = arith.constant 0 : index
    %c0_58 = arith.constant 0 : index
    %46 = vector.load %arg2[%c2_55, %c0_56, %c0_57, %c0_58] : memref<3x3x48x2xf32, #tpu.memory_space<vmem>>, vector<1x1x48x2xf32>
    %47 = vector.shape_cast %46 : vector<1x1x48x2xf32> to vector<48x2xf32>
    %cst_59 = arith.constant dense<0.000000e+00> : vector<256x2xf32>
    %48 = tpu.matmul %45, %47, %cst_59 {dimension_numbers = #tpu.dot_dimension_numbers<[1], [0], [0], [1], [0, 0, 1, 1], [], []>} : vector<256x48xf32>, vector<48x2xf32>, vector<256x2xf32> -> vector<256x2xf32>
    %49 = arith.addf %42, %48 : vector<256x2xf32>
    %c0_60 = arith.constant 0 : index
    %c2_61 = arith.constant 2 : index
    %c1_62 = arith.constant 1 : index
    %c0_63 = arith.constant 0 : index
    %50 = vector.load %arg1[%c0_60, %c2_61, %c1_62, %c0_63] : memref<1x18x18x48xf32, #tpu.memory_space<vmem>>, vector<1x16x16x48xf32>
    %51 = vector.shape_cast %50 : vector<1x16x16x48xf32> to vector<16x16x48xf32>
    %52 = vector.shape_cast %51 : vector<16x16x48xf32> to vector<256x48xf32>
    %c2_64 = arith.constant 2 : index
    %c1_65 = arith.constant 1 : index
    %c0_66 = arith.constant 0 : index
    %c0_67 = arith.constant 0 : index
    %53 = vector.load %arg2[%c2_64, %c1_65, %c0_66, %c0_67] : memref<3x3x48x2xf32, #tpu.memory_space<vmem>>, vector<1x1x48x2xf32>
    %54 = vector.shape_cast %53 : vector<1x1x48x2xf32> to vector<48x2xf32>
    %cst_68 = arith.constant dense<0.000000e+00> : vector<256x2xf32>
    %55 = tpu.matmul %52, %54, %cst_68 {dimension_numbers = #tpu.dot_dimension_numbers<[1], [0], [0], [1], [0, 0, 1, 1], [], []>} : vector<256x48xf32>, vector<48x2xf32>, vector<256x2xf32> -> vector<256x2xf32>
    %56 = arith.addf %49, %55 : vector<256x2xf32>
    %c0_69 = arith.constant 0 : index
    %c2_70 = arith.constant 2 : index
    %c2_71 = arith.constant 2 : index
    %c0_72 = arith.constant 0 : index
    %57 = vector.load %arg1[%c0_69, %c2_70, %c2_71, %c0_72] : memref<1x18x18x48xf32, #tpu.memory_space<vmem>>, vector<1x16x16x48xf32>
    %58 = vector.shape_cast %57 : vector<1x16x16x48xf32> to vector<16x16x48xf32>
    %59 = vector.shape_cast %58 : vector<16x16x48xf32> to vector<256x48xf32>
    %c2_73 = arith.constant 2 : index
    %c2_74 = arith.constant 2 : index
    %c0_75 = arith.constant 0 : index
    %c0_76 = arith.constant 0 : index
    %60 = vector.load %arg2[%c2_73, %c2_74, %c0_75, %c0_76] : memref<3x3x48x2xf32, #tpu.memory_space<vmem>>, vector<1x1x48x2xf32>
    %61 = vector.shape_cast %60 : vector<1x1x48x2xf32> to vector<48x2xf32>
    %cst_77 = arith.constant dense<0.000000e+00> : vector<256x2xf32>
    %62 = tpu.matmul %59, %61, %cst_77 {dimension_numbers = #tpu.dot_dimension_numbers<[1], [0], [0], [1], [0, 0, 1, 1], [], []>} : vector<256x48xf32>, vector<48x2xf32>, vector<256x2xf32> -> vector<256x2xf32>
    %63 = arith.addf %56, %62 : vector<256x2xf32>
    %64 = tpu.transpose %63, [1, 0] : vector<256x2xf32> -> vector<2x256xf32>
    %c0_78 = arith.constant 0 : index
    %c0_79 = arith.constant 0 : index
    %65 = vector.load %arg3[%c0_78, %c0_79] : memref<2x1xf32, #tpu.memory_space<vmem>>, vector<2x1xf32>
    %66 = vector.broadcast %65 : vector<2x1xf32> to vector<2x256xf32>
    %67 = arith.addf %64, %66 : vector<2x256xf32>
    %c0_80 = arith.constant 0 : index
    %c0_81 = arith.constant 0 : index
    %c0_82 = arith.constant 0 : index
    %68 = vector.load %arg4[%c0_80, %c0_81, %c0_82] : memref<1x2x256xf32, #tpu.memory_space<vmem>>, vector<1x2x256xf32>
    %69 = vector.shape_cast %68 : vector<1x2x256xf32> to vector<2x256xf32>
    %70 = arith.addf %67, %69 : vector<2x256xf32>
    %c0_83 = arith.constant 0 : index
    %c0_84 = arith.constant 0 : index
    %c0_85 = arith.constant 0 : index
    %71 = vector.load %arg5[%c0_83, %c0_84, %c0_85] : memref<1x2x256xf32, #tpu.memory_space<vmem>>, vector<1x2x256xf32>
    %72 = vector.shape_cast %71 : vector<1x2x256xf32> to vector<2x256xf32>
    %73 = vector.shape_cast %70 : vector<2x256xf32> to vector<1x2x256xf32>
    tpu.vector_store %arg5[%c0_83, %c0_84, %c0_85], %73 {strides = array<i32>} : memref<1x2x256xf32, #tpu.memory_space<vmem>>, vector<1x2x256xf32>,
    return
  }
  func.func @transform_0(%arg0: i32) -> (i32, i32, i32, i32) {
    %c0_i32 = arith.constant 0 : i32
    %c0_i32_0 = arith.constant 0 : i32
    %c0_i32_1 = arith.constant 0 : i32
    %c0_i32_2 = arith.constant 0 : i32
    return %arg0, %c0_i32, %c0_i32_0, %c0_i32_1 : i32, i32, i32, i32
  }
  func.func @transform_1(%arg0: i32) -> (i32, i32, i32, i32) {
    %c0_i32 = arith.constant 0 : i32
    %c0_i32_0 = arith.constant 0 : i32
    %c0_i32_1 = arith.constant 0 : i32
    %c0_i32_2 = arith.constant 0 : i32
    %c0_i32_3 = arith.constant 0 : i32
    return %c0_i32, %c0_i32_0, %c0_i32_1, %c0_i32_2 : i32, i32, i32, i32
  }
  func.func @transform_2(%arg0: i32) -> (i32, i32) {
    %c0_i32 = arith.constant 0 : i32
    %c0_i32_0 = arith.constant 0 : i32
    %c0_i32_1 = arith.constant 0 : i32
    return %c0_i32, %c0_i32_0 : i32, i32
  }
  func.func @transform_3(%arg0: i32) -> (i32, i32, i32) {
    %c0_i32 = arith.constant 0 : i32
    %c0_i32_0 = arith.constant 0 : i32
    %c0_i32_1 = arith.constant 0 : i32
    return %arg0, %c0_i32, %c0_i32_0 : i32, i32, i32
  }
  func.func @transform_4(%arg0: i32) -> (i32, i32, i32) {
    %c0_i32 = arith.constant 0 : i32
    %c0_i32_0 = arith.constant 0 : i32
    %c0_i32_1 = arith.constant 0 : i32
    return %arg0, %c0_i32, %c0_i32_0 : i32, i32, i32
  }
}

</mosaic_0001>

<bundles_post_ra>
// kernel: tpu_custom_call.1
= control target key start
LH: loop header
LB: loop body
LE: loop exit
PB: predicated region body
PF: predicated region fallthrough
CT: control target
= control target key end

     0   :  { %9 = vsyncpa [#allocation3], 0  ;;  %s6968_s0 = inlined_call_operand.vmem [shape: f32[2,18,18,48], index: 0, kind: input, shape index: {}]   ;;  %s6969_s1 = inlined_call_operand.vmem [shape: f32[3,3,48,2], index: 1, kind: input, shape index: {}]   ;;  %s6970_s2 = inlined_call_operand.vmem [shape: f32[2,1], index: 2, kind: input, shape index: {}]   ;;  %s6971_s3 = inlined_call_operand.vmem [shape: f32[2,2,256], index: 3, kind: input, shape index: {}]   ;;  %s6972_s4 = inlined_call_operand.hbm [shape: f32[2,2,256], index: 4, kind: output, shape index: {}]  }
   0x1   :  { %11 = vsyncpa [#allocation3 + $0x1], 0  ;;  %s5437_s15 = smov 0   ;;  %s5439_s16 = smov 0  }
   0x2   :  { %s5441_s17 = smov 0   ;;  %s5443_s18 = smov 0  }
   0x3 LB: > { %s5458_s19 = sadd.s32 4294967295, %s5408_s18   ;;  %s3866_s20 = sadd.s32 4294967294, %s5408_s18   ;;  %s5408_s18 = sphi %s5443_s18, %s7072_s18   ;;  %s5404_s17 = sphi %s5441_s17, %s7071_s17   ;;  %s5400_s16 = sphi %s5439_s16, %s7070_s16   ;;  %s5396_s15 = sphi %s5437_s15, %s7069_s15  }
   0x4   : > { %s5462_s21 = sadd.s32 1, %s5408_s18   ;;  %s118_s22 = sadd.s32 1, %s5404_s17 }
   0x5   : > { %s115_s23 = ssub.s32 %s5408_s18, %s5462_s21  ;;  %p128_p0 = scmp.ne.s32.totalorder %s5404_s17, %s5400_s16 }
   0x6   : > { %p116_p1 = scmp.eq.s32.totalorder %s115_s23, 0  ;;  %p129_p2 = scmp.eq.s32.totalorder %s5458_s19, 1 }
   0x7   : > { %p134_p3 = scmp.ne.s32.totalorder %s5400_s16, %s5396_s15  ;;  %p135_p4 = scmp.eq.s32.totalorder %s3866_s20, 1 }
   0x8   : > { %s5473_s24 = scalar_select %p116_p1, %s5404_s17, %s118_s22  }
   0x9   : > { %p5475_p5 = por %p129_p2, %p128_p0  ;;  %p5479_p6 = por %p135_p4, %p134_p3 }
   0xa   : > { %p3869_p7 = scmp.ge.s32.totalorder %s5408_s18, 1  ;;  %p175_p8 = scmp.lt.s32.totalorder %s5408_s18, 3 }
   0xc   : > { %p176_p9 = pnand %p3869_p7, %p175_p8 }
   0xe   : > { %179 = sbr.rel (%p176_p9) target bundleno = 632 (0x278), region = 36 }
  0x13   : > { %v3879_v0 = vld [vmem:[%s6969_s1 + $0x58] sm:$0xff]  ;;  %v3878_v1 = vld [vmem:[%s6969_s1 + $0x50] sm:$0xff]  ;;  %p206_p10 = scmp.lt.s32.totalorder %s5458_s19, 1  ;;  %v3877_v2 = vld [vmem:[%s6969_s1 + $0x48] sm:$0xff]  ;;  %vm293_vm0 = vcmask 392192   ;;  %s4410_s22 = sshll.u32 %s5458_s19, 6 }
  0x14   : > { %5293 = vmatprep.subr.mxu1 %v3879_v0  ;;  %4753 = vmatprep.subr.mxu0 %v3879_v0  ;;  %v3876_v3 = vld [vmem:[%s6969_s1 + $0x40] sm:$0xff]  ;;  %v3875_v4 = vld [vmem:[%s6969_s1 + $0x38] sm:$0xff]  ;;  %v3874_v5 = vld [vmem:[%s6969_s1 + $0x30] sm:$0xff]  ;;  %s3793_s29 = scalar_lea.hbm %s6972_s4, %s4410_s22  ;;  %s5411_s6 = smov [#allocation2]  }
  0x15   : > { %5299 = vmatpush3.msra.mxu1 %v3879_v0  ;;  %4754 = vmatpush3.msra.mxu0 %v3879_v0  ;;  %s5496_s7 = scalar_select %p206_p10, %s5458_s19, 1  ;;  %v253_v9 = vld [vmem:[%s6969_s1 + $0x28] sm:$0xff]  ;;  %v252_v15 = vld [vmem:[%s6969_s1 + $0x20] sm:$0xff]  ;;  %v251_v20 = vld [vmem:[%s6969_s1 + $0x18] sm:$0xff] }
  0x16   : > { %5294 = vmatprep.subr.mxu1 %v3878_v1  ;;  %4755 = vmatprep.subr.mxu0 %v3878_v1  ;;  %v3949_v11 = vld [vmem:[%s6969_s1 + $0x88] sm:$0xff]  ;;  %v3948_v19 = vld [vmem:[%s6969_s1 + $0x80] sm:$0xff]  ;;  %v3947_v25 = vld [vmem:[%s6969_s1 + $0x78] sm:$0xff] }
  0x17   : > { %5300 = vmatpush3.msra.mxu1 %v3878_v1  ;;  %4756 = vmatpush3.msra.mxu0 %v3878_v1  ;;  %s5305_s10 = smul.u32 432, %s5496_s7  ;;  %v250_v26 = vld [vmem:[%s6969_s1 + $0x10] sm:$0xff]  ;;  %v249_v32 = vld [vmem:[%s6969_s1 + $0x8] sm:$0xff]  ;;  %v248_v38 = vld [vmem:[%s6969_s1] sm:$0xff]  ;;  %s4409_s9 = sshll.u32 %s5496_s7, 2 }
  0x18   : > { %5295 = vmatprep.subr.mxu1 %v3877_v2  ;;  %4757 = vmatprep.subr.mxu0 %v3877_v2  ;;  %v3946_v31 = vld [vmem:[%s6969_s1 + $0x70] sm:$0xff]  ;;  %v3945_v37 = vld [vmem:[%s6969_s1 + $0x68] sm:$0xff]  ;;  %v3944_v43 = vld [vmem:[%s6969_s1 + $0x60] sm:$0xff]  ;;  %s215_s13 = scalar_lea.vmem %s6971_s3, %s4409_s9 }
  0x19   : > { %5301 = vmatpush3.msra.mxu1 %v3877_v2  ;;  %4758 = vmatpush3.msra.mxu0 %v3877_v2  ;;  %s5508_s20 = scalar_lea.vmem %s6968_s0, %s5305_s10  ;;  %v4019_v44 = vld [vmem:[%s6969_s1 + $0xb8] sm:$0xff]  ;;  %v4089_v49 = vld [vmem:[%s6969_s1 + $0xe8] sm:$0xff]  ;;  %v4018_v58 = vld [vmem:[%s6969_s1 + $0xb0] sm:$0xff]  ;;  %s203_s10 = sand.u32 1, %s5400_s16  }
  0x1a   : > { %5296 = vmatprep.subr.mxu1 %v3876_v3  ;;  %4759 = vmatprep.subr.mxu0 %v3876_v3  ;;  %v5514_v6 = vld [vmem:[%s5508_s20 + $0xc1] sm:$0xff]  ;;  %v5518_v8 = vld [vmem:[%s5508_s20 + $0xc9] sm:$0xff]  ;;  %v5531_v12 = vld [vmem:[%s5508_s20 + $0xd9] sm:$0xff]  ;;  %s3870_s14 = sshll.u32 %s203_s10, 2  ;;  %s3781_s30 = scalar_lea.sflag [#allocation3], %s203_s10 }
  0x1b   : > { %5302 = vmatpush3.msra.mxu1 %v3876_v3  ;;  %4760 = vmatpush3.msra.mxu0 %v3876_v3  ;;  %v254_v7 = vld [vmem:[%s5508_s20 + $0x1] sm:$0xff]  ;;  %v255_v10 = vld [vmem:[%s5508_s20 + $0x9] sm:$0xff]  ;;  %v5536_v13 = vld [vmem:[%s5508_s20 + $0x19] sm:$0xff]  ;;  %s205_s23 = scalar_lea.vmem [#allocation2], %s3870_s14 }
  0x1c   : > { %5297 = vmatprep.subr.mxu1 %v3875_v4  ;;  %4761 = vmatprep.subr.mxu0 %v3875_v4  ;;  %v5540_v14 = vld [vmem:[%s5508_s20 + $0xe1] sm:$0xff]  ;;  %v5551_v17 = vld [vmem:[%s5508_s20 + $0xf1] sm:$0xff]  ;;  %v5571_v21 = vld [vmem:[%s5508_s20 + $0xf9] sm:$0xff]  ;;  %s3795_s27 = sshll.u32 %s205_s23, 4  ;;  %s3796_s27 = int_to_ptr.vmem [resolvable:$true] %s3795_s27 }
  0x1d   : > { %5303 = vmatpush3.msra.mxu1 %v3875_v4  ;;  %4762 = vmatpush3.msra.mxu0 %v3875_v4  ;;  %v5548_v16 = vld [vmem:[%s5508_s20 + $0x21] sm:$0xff]  ;;  %v5556_v18 = vld [vmem:[%s5508_s20 + $0x31] sm:$0xff]  ;;  %v5576_v22 = vld [vmem:[%s5508_s20 + $0x39] sm:$0xff]  ;;  %s5348_s5 = scalar_lea.vmem %s3796_s27, 64 }
  0x1e   : > { %5298 = vmatprep.subr.mxu1 %v3874_v5  ;;  %4763 = vmatprep.subr.mxu0 %v3874_v5  ;;  %v5579_v23 = vld [vmem:[%s5508_s20 + $0x109] sm:$0xff]  ;;  %v5597_v27 = vld [vmem:[%s5508_s20 + $0x111] sm:$0xff]  ;;  %v5605_v29 = vld [vmem:[%s5508_s20 + $0x121] sm:$0xff]  ;;  %p5349_p11 = scmp.ne.s32.totalorder %s3796_s27, %s5348_s5 }
  0x1f   : > { %5304 = vmatpush3.msra.mxu1 %v3874_v5  ;;  %4789 = vmatprep.mubr.msk.f32.mxu1 %vm293_vm0, %v5514_v6  ;;  %v5582_v24 = vld [vmem:[%s5508_s20 + $0x49] sm:$0xff]  ;;  %v5602_v28 = vld [vmem:[%s5508_s20 + $0x51] sm:$0xff]  ;;  %v5608_v30 = vld [vmem:[%s5508_s20 + $0x61] sm:$0xff] }
  0x20   : > { %4764 = vmatpush3.msra.mxu0 %v3874_v5  ;;  %4765 = vmatprep.mubr.msk.f32.mxu0 %vm293_vm0, %v254_v7  ;;  %v5623_v33 = vld [vmem:[%s5508_s20 + $0x129] sm:$0xff]  ;;  %v5631_v35 = vld [vmem:[%s5508_s20 + $0x139] sm:$0xff]  ;;  %v5649_v39 = vld [vmem:[%s5508_s20 + $0x141] sm:$0xff]  ;;  %p5350_p12 = pnand %p5349_p11, %p5475_p5 }
  0x21   : > { %4790 = vmatmul.mubr.msk.f32.vlgmr.msra.gmra.mxu1 %vm293_vm0, %v5518_v8  ;;  %4813 = vmatprep.subr.mxu1 %v253_v9  ;;  %v5628_v34 = vld [vmem:[%s5508_s20 + $0x69] sm:$0xff]  ;;  %v5634_v36 = vld [vmem:[%s5508_s20 + $0x79] sm:$0xff]  ;;  %v5654_v40 = vld [vmem:[%s5508_s20 + $0x81] sm:$0xff] }
  0x22   : > { %4766 = vmatmul.mubr.msk.f32.vlgmr.msra.gmra.mxu0 %vm293_vm0, %v255_v10  ;;  %4814 = vmatpush3.msra.mxu1 %v253_v9  ;;  %v5657_v41 = vld [vmem:[%s5508_s20 + $0x151] sm:$0xff]  ;;  %v5675_v45 = vld [vmem:[%s5508_s20 + $0x159] sm:$0xff]  ;;  %v5683_v47 = vld [vmem:[%s5508_s20 + $0x169] sm:$0xff]  ;;  %p5351_p13 = pneg %p5350_p12 }
  0x23   : > { %4873 = vmatprep.subr.mxu0 %v3949_v11  ;;  %4792 = vmatprep.mubr.msk.f32.mxu1 %vm293_vm0, %v5531_v12  ;;  %v5660_v42 = vld [vmem:[%s5508_s20 + $0x91] sm:$0xff]  ;;  %v5680_v46 = vld [vmem:[%s5508_s20 + $0x99] sm:$0xff]  ;;  %v5686_v48 = vld [vmem:[%s5508_s20 + $0xa9] sm:$0xff] }
  0x24   : > { %4874 = vmatpush3.msra.mxu0 %v3949_v11  ;;  %4768 = vmatprep.mubr.msk.f32.mxu0 %vm293_vm0, %v5536_v13  ;;  %v5698_v50 = vld [vmem:[%s5508_s20 + $0x171] sm:$0xff]  ;;  %v216_v52 = vld [vmem:[%s5508_s20] sm:$0xff]  ;;  %v217_v54 = vld [vmem:[%s5508_s20 + $0x8] sm:$0xff] }
  0x25   : > { %4793 = vmatmul.mubr.msk.f32.gmra.mxu1 %vm293_vm0, %v5540_v14  ;;  %4815 = vmatprep.subr.mxu1 %v252_v15  ;;  %7009 = vst [vmem:[#allocation5_spill] sm:$0xff] %v5698_v50  ;;  %v5703_v51 = vld [vmem:[%s5508_s20 + $0xb1] sm:$0xff]  ;;  %v936_v53 = vld [vmem:[%s5508_s20 + $0x2] sm:$0xff]  ;;  %v5720_v57 = vld [vmem:[%s5508_s20 + $0x1a] sm:$0xff] }
  0x26   : > { %4769 = vmatmul.mubr.msk.f32.gmra.mxu0 %vm293_vm0, %v5548_v16  ;;  %4795 = vmatprep.mubr.msk.f32.mxu1 %vm293_vm0, %v5551_v17  ;;  %v937_v55 = vld [vmem:[%s5508_s20 + $0xa] sm:$0xff]  ;;  %v5716_v56 = vld [vmem:[%s5508_s20 + $0x18] sm:$0xff]  ;;  %7010 = vst [vmem:[#allocation6_spill] sm:$0xff] %v5720_v57  ;;  %v5727_v59 = vld [vmem:[%s5508_s20 + $0x20] sm:$0xff] }
  0x27   : > { %4816 = vmatpush3.msra.mxu1 %v252_v15  ;;  %4771 = vmatprep.mubr.msk.f32.mxu0 %vm293_vm0, %v5556_v18  ;;  %v4088_v60 = vld [vmem:[%s6969_s1 + $0xe0] sm:$0xff]  ;;  %v5738_v62 = vld [vmem:[%s5508_s20 + $0x30] sm:$0xff]  ;;  %v4017_v0 = vld [vmem:[%s6969_s1 + $0xa8] sm:$0xff] }
  0x28   : > { %4875 = vmatprep.subr.mxu0 %v3948_v19  ;;  %4817 = vmatprep.subr.mxu1 %v251_v20  ;;  %v5735_v61 = vld [vmem:[%s5508_s20 + $0x22] sm:$0xff]  ;;  %v5743_v63 = vld [vmem:[%s5508_s20 + $0x32] sm:$0xff]  ;;  %v5763_v3 = vld [vmem:[%s5508_s20 + $0x3a] sm:$0xff] }
  0x29   : > { %4796 = vmatmul.mubr.msk.f32.gmra.mxu1 %vm293_vm0, %v5571_v21  ;;  %4876 = vmatpush3.msra.mxu0 %v3948_v19  ;;  %7011 = vst [vmem:[#allocation7_spill] sm:$0xff] %v5735_v61  ;;  %7012 = vst [vmem:[#allocation8_spill] sm:$0xff] %v5743_v63  ;;  %v5755_v1 = vld [vmem:[%s5508_s20 + $0x38] sm:$0xff]  ;;  %v5766_v4 = vld [vmem:[%s5508_s20 + $0x48] sm:$0xff] }
  0x2a   : > { %4772 = vmatmul.mubr.msk.f32.gmra.mxu0 %vm293_vm0, %v5576_v22  ;;  %4798 = vmatprep.mubr.msk.f32.mxu1 %vm293_vm0, %v5579_v23  ;;  %v4087_v2 = vld [vmem:[%s6969_s1 + $0xd8] sm:$0xff]  ;;  %7013 = vst [vmem:[#allocation9_spill] sm:$0xff] %v5763_v3  ;;  %v5769_v5 = vld [vmem:[%s5508_s20 + $0x4a] sm:$0xff]  ;;  %v4016_v7 = vld [vmem:[%s6969_s1 + $0xa0] sm:$0xff] }
  0x2b   : > { %4774 = vmatprep.mubr.msk.f32.mxu0 %vm293_vm0, %v5582_v24  ;;  %4818 = vmatpush3.msra.mxu1 %v251_v20  ;;  %7014 = vst [vmem:[#allocation10_spill] sm:$0xff] %v5769_v5  ;;  %v5781_v9 = vld [vmem:[%s5508_s20 + $0x50] sm:$0xff]  ;;  %v5792_v15 = vld [vmem:[%s5508_s20 + $0x60] sm:$0xff]  ;;  %v4015_v20 = vld [vmem:[%s6969_s1 + $0x98] sm:$0xff] }
  0x2c   : > { %4877 = vmatprep.subr.mxu0 %v3947_v25  ;;  %4819 = vmatprep.subr.mxu1 %v250_v26  ;;  %v4086_v10 = vld [vmem:[%s6969_s1 + $0xd0] sm:$0xff]  ;;  %v5795_v19 = vld [vmem:[%s5508_s20 + $0x62] sm:$0xff] }
  0x2d   : > { %4799 = vmatmul.mubr.msk.f32.gmra.mxu1 %vm293_vm0, %v5597_v27  ;;  %4878 = vmatpush3.msra.mxu0 %v3947_v25  ;;  %v5789_v11 = vld [vmem:[%s5508_s20 + $0x52] sm:$0xff]  ;;  %7016 = vst [vmem:[#allocation12_spill] sm:$0xff] %v5795_v19  ;;  %v5807_v25 = vld [vmem:[%s5508_s20 + $0x68] sm:$0xff] }
  0x2e   : > { %4775 = vmatmul.mubr.msk.f32.gmra.mxu0 %vm293_vm0, %v5602_v28  ;;  %4801 = vmatprep.mubr.msk.f32.mxu1 %vm293_vm0, %v5605_v29  ;;  %7015 = vst [vmem:[#allocation11_spill] sm:$0xff] %v5789_v11 }
  0x2f   : > { %4777 = vmatprep.mubr.msk.f32.mxu0 %vm293_vm0, %v5608_v30  ;;  %4820 = vmatpush3.msra.mxu1 %v250_v26  ;;  %v4085_v26 = vld [vmem:[%s6969_s1 + $0xc8] sm:$0xff] }
  0x30   : > { %4879 = vmatprep.subr.mxu0 %v3946_v31  ;;  %4821 = vmatprep.subr.mxu1 %v249_v32 }
  0x31   : > { %4802 = vmatmul.mubr.msk.f32.gmra.mxu1 %vm293_vm0, %v5623_v33  ;;  %4880 = vmatpush3.msra.mxu0 %v3946_v31  ;;  %v5815_v31 = vld [vmem:[%s5508_s20 + $0x6a] sm:$0xff] }
  0x32   : > { %4778 = vmatmul.mubr.msk.f32.gmra.mxu0 %vm293_vm0, %v5628_v34  ;;  %4804 = vmatprep.mubr.msk.f32.mxu1 %vm293_vm0, %v5631_v35  ;;  %7017 = vst [vmem:[#allocation13_spill] sm:$0xff] %v5815_v31 }
  0x33   : > { %4780 = vmatprep.mubr.msk.f32.mxu0 %vm293_vm0, %v5634_v36  ;;  %4822 = vmatpush3.msra.mxu1 %v249_v32  ;;  %v5818_v32 = vld [vmem:[%s5508_s20 + $0x78] sm:$0xff] }
  0x34   : > { %4881 = vmatprep.subr.mxu0 %v3945_v37  ;;  %4823 = vmatprep.subr.mxu1 %v248_v38 }
  0x35   : > { %4805 = vmatmul.mubr.msk.f32.gmra.mxu1 %vm293_vm0, %v5649_v39  ;;  %4882 = vmatpush3.msra.mxu0 %v3945_v37  ;;  %v5821_v37 = vld [vmem:[%s5508_s20 + $0x7a] sm:$0xff] }
  0x36   : > { %4781 = vmatmul.mubr.msk.f32.gmra.mxu0 %vm293_vm0, %v5654_v40  ;;  %4807 = vmatprep.mubr.msk.f32.mxu1 %vm293_vm0, %v5657_v41  ;;  %7018 = vst [vmem:[#allocation14_spill] sm:$0xff] %v5821_v37 }
  0x37   : > { %4783 = vmatprep.mubr.msk.f32.mxu0 %vm293_vm0, %v5660_v42  ;;  %4824 = vmatpush3.msra.mxu1 %v248_v38  ;;  %v4014_v38 = vld [vmem:[%s6969_s1 + $0x90] sm:$0xff] }
  0x38   : > { %4883 = vmatprep.subr.mxu0 %v3944_v43  ;;  %4933 = vmatprep.subr.mxu1 %v4019_v44 }
  0x39   : > { %4808 = vmatmul.mubr.msk.f32.gmra.mxu1 %vm293_vm0, %v5675_v45  ;;  %4884 = vmatpush3.msra.mxu0 %v3944_v43  ;;  %v5833_v43 = vld [vmem:[%s5508_s20 + $0x80] sm:$0xff] }
  0x3a   : > { %4784 = vmatmul.mubr.msk.f32.gmra.mxu0 %vm293_vm0, %v5680_v46  ;;  %4810 = vmatprep.mubr.msk.f32.mxu1 %vm293_vm0, %v5683_v47 }
  0x3b   : > { %4786 = vmatprep.mubr.msk.f32.mxu0 %vm293_vm0, %v5686_v48  ;;  %4993 = vmatprep.subr.mxu0 %v4089_v49 }
  0x3d   : > { %4811 = vmatmul.mubr.msk.f32.gmra.mxu1 %vm293_vm0, %v5698_v50  ;;  %v6039_v50 = vld [vmem:[%s5508_s20 + $0x16a] sm:$0xff] }
  0x3e   : > { %4787 = vmatmul.mubr.msk.f32.gmra.mxu0 %vm293_vm0, %v5703_v51  ;;  %4825 = vmatprep.mubr.msk.f32.mxu1 %vm293_vm0, %v216_v52  ;;  %v5844_v52 = vld [vmem:[%s5508_s20 + $0x90] sm:$0xff]  ;;  %7037 = vst [vmem:[#allocation33_spill] sm:$0xff] %v6039_v50 }
  0x3f   : > { %4885 = vmatprep.mubr.msk.f32.mxu0 %vm293_vm0, %v936_v53  ;;  %v5847_v53 = vld [vmem:[%s5508_s20 + $0x92] sm:$0xff] }
  0x40   : > { %7020 = vst [vmem:[#allocation16_spill] sm:$0xff] %v5847_v53 }
  0x41   : > { %4826 = vmatmul.mubr.msk.f32.vlgmr.msra.gmra.mxu1 %vm293_vm0, %v217_v54  ;;  %v5854_v54 = vld [vmem:[%s6969_s1 + $0x118] sm:$0xff] }
  0x42   : > { %4886 = vmatmul.mubr.msk.f32.vlgmr.msra.gmra.mxu0 %vm293_vm0, %v937_v55  ;;  %4934 = vmatpush3.msra.mxu1 %v4019_v44  ;;  %v4084_v44 = vld [vmem:[%s6969_s1 + $0xc0] sm:$0xff]  ;;  %v5861_v55 = vld [vmem:[%s5508_s20 + $0x98] sm:$0xff] }
  0x43   : > { %4828 = vmatprep.mubr.msk.f32.mxu1 %vm293_vm0, %v5716_v56  ;;  %4994 = vmatpush3.msra.mxu0 %v4089_v49  ;;  %v5841_v49 = vld [vmem:[%s5508_s20 + $0x82] sm:$0xff] }
  0x44   : > { %4888 = vmatprep.mubr.msk.f32.mxu0 %vm293_vm0, %v5720_v57  ;;  %4935 = vmatprep.subr.mxu1 %v4018_v58  ;;  %7019 = vst [vmem:[#allocation15_spill] sm:$0xff] %v5841_v49  ;;  %v6036_v57 = vld [vmem:[%s5508_s20 + $0x168] sm:$0xff] }
  0x45   : > { %4829 = vmatmul.mubr.msk.f32.gmra.mxu1 %vm293_vm0, %v5727_v59  ;;  %4995 = vmatprep.subr.mxu0 %v4088_v60 }
  0x46   : > { %4889 = vmatmul.mubr.msk.f32.gmra.mxu0 %vm293_vm0, %v5735_v61  ;;  %4831 = vmatprep.mubr.msk.f32.mxu1 %vm293_vm0, %v5738_v62  ;;  %v6019_v61 = vld [vmem:[%s5508_s20 + $0x152] sm:$0xff] }
  0x47   : > { %4891 = vmatprep.mubr.msk.f32.mxu0 %vm293_vm0, %v5743_v63  ;;  %4936 = vmatpush3.msra.mxu1 %v4018_v58  ;;  %v5866_v58 = vld [vmem:[%s6969_s1 + $0x148] sm:$0xff]  ;;  %v6016_v63 = vld [vmem:[%s5508_s20 + $0x150] sm:$0xff]  ;;  %7036 = vst [vmem:[#allocation32_spill] sm:$0xff] %v6019_v61 }
  0x48   : > { %4996 = vmatpush3.msra.mxu0 %v4088_v60  ;;  %4937 = vmatprep.subr.mxu1 %v4017_v0  ;;  %v5871_v60 = vld [vmem:[%s5508_s20 + $0x9a] sm:$0xff] }
  0x49   : > { %4832 = vmatmul.mubr.msk.f32.gmra.mxu1 %vm293_vm0, %v5755_v1  ;;  %4997 = vmatprep.subr.mxu0 %v4087_v2  ;;  %7021 = vst [vmem:[#allocation17_spill] sm:$0xff] %v5871_v60 }
  0x4a   : > { %4892 = vmatmul.mubr.msk.f32.gmra.mxu0 %vm293_vm0, %v5763_v3  ;;  %4834 = vmatprep.mubr.msk.f32.mxu1 %vm293_vm0, %v5766_v4  ;;  %v5999_v3 = vld [vmem:[%s5508_s20 + $0x13a] sm:$0xff] }
  0x4b   : > { %4894 = vmatprep.mubr.msk.f32.mxu0 %vm293_vm0, %v5769_v5  ;;  %4938 = vmatpush3.msra.mxu1 %v4017_v0  ;;  %v5874_v0 = vld [vmem:[%s5508_s20 + $0xa8] sm:$0xff]  ;;  %v5996_v5 = vld [vmem:[%s5508_s20 + $0x138] sm:$0xff]  ;;  %7034 = vst [vmem:[#allocation30_spill] sm:$0xff] %v5999_v3 }
  0x4c   : > { %4998 = vmatpush3.msra.mxu0 %v4087_v2  ;;  %4939 = vmatprep.subr.mxu1 %v4016_v7  ;;  %v5877_v2 = vld [vmem:[%s5508_s20 + $0xaa] sm:$0xff] }
  0x4d   : > { %4835 = vmatmul.mubr.msk.f32.gmra.mxu1 %vm293_vm0, %v5781_v9  ;;  %4999 = vmatprep.subr.mxu0 %v4086_v10  ;;  %7022 = vst [vmem:[#allocation18_spill] sm:$0xff] %v5877_v2 }
  0x4e   : > { %4895 = vmatmul.mubr.msk.f32.gmra.mxu0 %vm293_vm0, %v5789_v11  ;;  %4837 = vmatprep.mubr.msk.f32.mxu1 %vm293_vm0, %v5792_v15  ;;  %v5979_v11 = vld [vmem:[%s5508_s20 + $0x122] sm:$0xff] }
  0x4f   : > { %4897 = vmatprep.mubr.msk.f32.mxu0 %vm293_vm0, %v5795_v19  ;;  %4940 = vmatpush3.msra.mxu1 %v4016_v7  ;;  %v5888_v7 = vld [vmem:[%s5508_s20 + $0xb0] sm:$0xff]  ;;  %v5976_v19 = vld [vmem:[%s5508_s20 + $0x120] sm:$0xff]  ;;  %7032 = vst [vmem:[#allocation28_spill] sm:$0xff] %v5979_v11 }
  0x50   : > { %5000 = vmatpush3.msra.mxu0 %v4086_v10  ;;  %4941 = vmatprep.subr.mxu1 %v4015_v20  ;;  %v5893_v10 = vld [vmem:[%s5508_s20 + $0xb2] sm:$0xff] }
  0x51   : > { %4838 = vmatmul.mubr.msk.f32.gmra.mxu1 %vm293_vm0, %v5807_v25  ;;  %5001 = vmatprep.subr.mxu0 %v4085_v26  ;;  %7023 = vst [vmem:[#allocation19_spill] sm:$0xff] %v5893_v10 }
  0x52   : > { %4898 = vmatmul.mubr.msk.f32.gmra.mxu0 %vm293_vm0, %v5815_v31  ;;  %4840 = vmatprep.mubr.msk.f32.mxu1 %vm293_vm0, %v5818_v32  ;;  %v5959_v31 = vld [vmem:[%s5508_s20 + $0x10a] sm:$0xff] }
  0x53   : > { %4900 = vmatprep.mubr.msk.f32.mxu0 %vm293_vm0, %v5821_v37  ;;  %4942 = vmatpush3.msra.mxu1 %v4015_v20  ;;  %v5896_v20 = vld [vmem:[%s5508_s20 + $0xc0] sm:$0xff]  ;;  %v5956_v37 = vld [vmem:[%s5508_s20 + $0x108] sm:$0xff]  ;;  %7030 = vst [vmem:[#allocation26_spill] sm:$0xff] %v5959_v31 }
  0x54   : > { %5002 = vmatpush3.msra.mxu0 %v4085_v26  ;;  %4943 = vmatprep.subr.mxu1 %v4014_v38  ;;  %v5899_v26 = vld [vmem:[%s5508_s20 + $0xc2] sm:$0xff] }
  0x55   : > { %4841 = vmatmul.mubr.msk.f32.gmra.mxu1 %vm293_vm0, %v5833_v43  ;;  %5003 = vmatprep.subr.mxu0 %v4084_v44  ;;  %7024 = vst [vmem:[#allocation20_spill] sm:$0xff] %v5899_v26 }
  0x56   : > { %4901 = vmatmul.mubr.msk.f32.gmra.mxu0 %vm293_vm0, %v5841_v49  ;;  %4843 = vmatprep.mubr.msk.f32.mxu1 %vm293_vm0, %v5844_v52  ;;  %v5939_v49 = vld [vmem:[%s5508_s20 + $0xf2] sm:$0xff] }
  0x57   : > { %4903 = vmatprep.mubr.msk.f32.mxu0 %vm293_vm0, %v5847_v53  ;;  %4944 = vmatpush3.msra.mxu1 %v4014_v38  ;;  %v5908_v38 = vld [vmem:[%s5508_s20 + $0xc8] sm:$0xff]  ;;  %v5936_v53 = vld [vmem:[%s5508_s20 + $0xf0] sm:$0xff]  ;;  %7028 = vst [vmem:[#allocation24_spill] sm:$0xff] %v5939_v49 }
  0x58   : > { %5004 = vmatpush3.msra.mxu0 %v4084_v44  ;;  %5053 = vmatprep.subr.mxu1 %v5854_v54  ;;  %v5913_v44 = vld [vmem:[%s5508_s20 + $0xca] sm:$0xff] }
  0x59   : > { %4844 = vmatmul.mubr.msk.f32.gmra.mxu1 %vm293_vm0, %v5861_v55  ;;  %5113 = vmatprep.subr.mxu0 %v5866_v58  ;;  %7025 = vst [vmem:[#allocation21_spill] sm:$0xff] %v5913_v44 }
  0x5a   : > { %4904 = vmatmul.mubr.msk.f32.gmra.mxu0 %vm293_vm0, %v5871_v60  ;;  %4846 = vmatprep.mubr.msk.f32.mxu1 %vm293_vm0, %v5874_v0  ;;  %v5919_v60 = vld [vmem:[%s5508_s20 + $0xda] sm:$0xff] }
  0x5b   : > { %4906 = vmatprep.mubr.msk.f32.mxu0 %vm293_vm0, %v5877_v2  ;;  %v5916_v2 = vld [vmem:[%s5508_s20 + $0xd8] sm:$0xff]  ;;  %7026 = vst [vmem:[#allocation22_spill] sm:$0xff] %v5919_v60 }
  0x5d   : > { %4847 = vmatmul.mubr.msk.f32.gmra.mxu1 %vm293_vm0, %v5888_v7 }
  0x5e   : > { %4907 = vmatmul.mubr.msk.f32.gmra.mxu0 %vm293_vm0, %v5893_v10  ;;  %4849 = vmatprep.mubr.msk.f32.mxu1 %vm293_vm0, %v5896_v20  ;;  %v5928_v10 = vld [vmem:[%s5508_s20 + $0xe0] sm:$0xff] }
  0x5f   : > { %4909 = vmatprep.mubr.msk.f32.mxu0 %vm293_vm0, %v5899_v26  ;;  %v5933_v26 = vld [vmem:[%s5508_s20 + $0xe2] sm:$0xff] }
  0x60   : > { %7027 = vst [vmem:[#allocation23_spill] sm:$0xff] %v5933_v26 }
  0x61   : > { %4850 = vmatmul.mubr.msk.f32.gmra.mxu1 %vm293_vm0, %v5908_v38 }
  0x62   : > { %4910 = vmatmul.mubr.msk.f32.gmra.mxu0 %vm293_vm0, %v5913_v44  ;;  %4852 = vmatprep.mubr.msk.f32.mxu1 %vm293_vm0, %v5916_v2  ;;  %v5948_v44 = vld [vmem:[%s5508_s20 + $0xf8] sm:$0xff] }
  0x63   : > { %4912 = vmatprep.mubr.msk.f32.mxu0 %vm293_vm0, %v5919_v60  ;;  %v5953_v60 = vld [vmem:[%s5508_s20 + $0xfa] sm:$0xff] }
  0x64   : > { %7029 = vst [vmem:[#allocation25_spill] sm:$0xff] %v5953_v60 }
  0x65   : > { %4853 = vmatmul.mubr.msk.f32.gmra.mxu1 %vm293_vm0, %v5928_v10 }
  0x66   : > { %4913 = vmatmul.mubr.msk.f32.gmra.mxu0 %vm293_vm0, %v5933_v26  ;;  %4855 = vmatprep.mubr.msk.f32.mxu1 %vm293_vm0, %v5936_v53  ;;  %v5968_v26 = vld [vmem:[%s5508_s20 + $0x110] sm:$0xff] }
  0x67   : > { %4915 = vmatprep.mubr.msk.f32.mxu0 %vm293_vm0, %v5939_v49  ;;  %v5973_v49 = vld [vmem:[%s5508_s20 + $0x112] sm:$0xff] }
  0x68   : > { %7031 = vst [vmem:[#allocation27_spill] sm:$0xff] %v5973_v49 }
  0x69   : > { %4856 = vmatmul.mubr.msk.f32.gmra.mxu1 %vm293_vm0, %v5948_v44 }
  0x6a   : > { %4916 = vmatmul.mubr.msk.f32.gmra.mxu0 %vm293_vm0, %v5953_v60  ;;  %4858 = vmatprep.mubr.msk.f32.mxu1 %vm293_vm0, %v5956_v37  ;;  %v5988_v60 = vld [vmem:[%s5508_s20 + $0x128] sm:$0xff] }
  0x6b   : > { %4918 = vmatprep.mubr.msk.f32.mxu0 %vm293_vm0, %v5959_v31  ;;  %v5993_v31 = vld [vmem:[%s5508_s20 + $0x12a] sm:$0xff] }
  0x6c   : > { %7033 = vst [vmem:[#allocation29_spill] sm:$0xff] %v5993_v31 }
  0x6d   : > { %4859 = vmatmul.mubr.msk.f32.gmra.mxu1 %vm293_vm0, %v5968_v26 }
  0x6e   : > { %4919 = vmatmul.mubr.msk.f32.gmra.mxu0 %vm293_vm0, %v5973_v49  ;;  %4861 = vmatprep.mubr.msk.f32.mxu1 %vm293_vm0, %v5976_v19  ;;  %v6008_v49 = vld [vmem:[%s5508_s20 + $0x140] sm:$0xff] }
  0x6f   : > { %4921 = vmatprep.mubr.msk.f32.mxu0 %vm293_vm0, %v5979_v11  ;;  %v6013_v11 = vld [vmem:[%s5508_s20 + $0x142] sm:$0xff] }
  0x70   : > { %7035 = vst [vmem:[#allocation31_spill] sm:$0xff] %v6013_v11 }
  0x71   : > { %4862 = vmatmul.mubr.msk.f32.gmra.mxu1 %vm293_vm0, %v5988_v60 }
  0x72   : > { %4922 = vmatmul.mubr.msk.f32.gmra.mxu0 %vm293_vm0, %v5993_v31  ;;  %4864 = vmatprep.mubr.msk.f32.mxu1 %vm293_vm0, %v5996_v5  ;;  %v6028_v31 = vld [vmem:[%s5508_s20 + $0x158] sm:$0xff] }
  0x73   : > { %4924 = vmatprep.mubr.msk.f32.mxu0 %vm293_vm0, %v5999_v3  ;;  %v6033_v3 = vld [vmem:[%s5508_s20 + $0x15a] sm:$0xff] }
  0x75   : > { %4865 = vmatmul.mubr.msk.f32.gmra.mxu1 %vm293_vm0, %v6008_v49 }
  0x76   : > { %4925 = vmatmul.mubr.msk.f32.gmra.mxu0 %vm293_vm0, %v6013_v11  ;;  %4867 = vmatprep.mubr.msk.f32.mxu1 %vm293_vm0, %v6016_v63  ;;  %v6048_v11 = vld [vmem:[%s5508_s20 + $0x170] sm:$0xff] }
  0x77   : > { %4927 = vmatprep.mubr.msk.f32.mxu0 %vm293_vm0, %v6019_v61  ;;  %v6053_v61 = vld [vmem:[%s5508_s20 + $0x172] sm:$0xff] }
  0x78   : > { %7038 = vst [vmem:[#allocation34_spill] sm:$0xff] %v6053_v61 }
  0x79   : > { %4868 = vmatmul.mubr.msk.f32.gmra.mxu1 %vm293_vm0, %v6028_v31 }
  0x7a   : > { %4928 = vmatmul.mubr.msk.f32.gmra.mxu0 %vm293_vm0, %v6033_v3  ;;  %4870 = vmatprep.mubr.msk.f32.mxu1 %vm293_vm0, %v6036_v57 }
  0x7b   : > { %4930 = vmatprep.mubr.msk.f32.mxu0 %vm293_vm0, %v6039_v50  ;;  %v4158_v50 = vld [vmem:[%s6969_s1 + $0x110] sm:$0xff] }
  0x7d   : > { %4871 = vmatmul.mubr.msk.f32.gmra.mxu1 %vm293_vm0, %v6048_v11 }
  0x7e   : > { %4931 = vmatmul.mubr.msk.f32.gmra.mxu0 %vm293_vm0, %v6053_v61  ;;  %4945 = vmatprep.mubr.msk.f32.mxu1 %vm293_vm0, %v5716_v56  ;;  %v4228_v61 = vld [vmem:[%s6969_s1 + $0x140] sm:$0xff]  ;;  %v7048_v56 = vld [vmem:[#allocation14_spill] sm:$0xff] }
  0x7f   : > { %5005 = vmatprep.mubr.msk.f32.mxu0 %vm293_vm0, %v5536_v13  ;;  %v4157_v13 = vld [vmem:[%s6969_s1 + $0x108] sm:$0xff] }
  0x81   : > { %4946 = vmatmul.mubr.msk.f32.vlgmr.msra.gmra.mxu1 %vm293_vm0, %v5727_v59  ;;  %v4365_v59 = vld [vmem:[%s6969_s1 + $0x188] sm:$0xff] }
  0x82   : > { %5006 = vmatmul.mubr.msk.f32.vlgmr.msra.gmra.mxu0 %vm293_vm0, %v5548_v16  ;;  %5054 = vmatpush3.msra.mxu1 %v5854_v54  ;;  %v4227_v16 = vld [vmem:[%s6969_s1 + $0x138] sm:$0xff] }
  0x83   : > { %4948 = vmatprep.mubr.msk.f32.mxu1 %vm293_vm0, %v5738_v62  ;;  %5114 = vmatpush3.msra.mxu0 %v5866_v58 }
  0x84   : > { %5008 = vmatprep.mubr.msk.f32.mxu0 %vm293_vm0, %v5556_v18  ;;  %5055 = vmatprep.subr.mxu1 %v4158_v50  ;;  %v4156_v18 = vld [vmem:[%s6969_s1 + $0x100] sm:$0xff] }
  0x85   : > { %4949 = vmatmul.mubr.msk.f32.gmra.mxu1 %vm293_vm0, %v5755_v1  ;;  %5115 = vmatprep.subr.mxu0 %v4228_v61 }
  0x86   : > { %5009 = vmatmul.mubr.msk.f32.gmra.mxu0 %vm293_vm0, %v5576_v22  ;;  %4951 = vmatprep.mubr.msk.f32.mxu1 %vm293_vm0, %v5766_v4  ;;  %v4226_v22 = vld [vmem:[%s6969_s1 + $0x130] sm:$0xff] }
  0x87   : > { %5011 = vmatprep.mubr.msk.f32.mxu0 %vm293_vm0, %v5582_v24  ;;  %5056 = vmatpush3.msra.mxu1 %v4158_v50  ;;  %v4155_v24 = vld [vmem:[%s6969_s1 + $0xf8] sm:$0xff]  ;;  %v7047_v50 = vld [vmem:[#allocation13_spill] sm:$0xff] }
  0x88   : > { %5116 = vmatpush3.msra.mxu0 %v4228_v61  ;;  %5057 = vmatprep.subr.mxu1 %v4157_v13  ;;  %v7049_v61 = vld [vmem:[#allocation15_spill] sm:$0xff] }
  0x89   : > { %4952 = vmatmul.mubr.msk.f32.gmra.mxu1 %vm293_vm0, %v5781_v9  ;;  %5117 = vmatprep.subr.mxu0 %v4227_v16 }
  0x8a   : > { %5012 = vmatmul.mubr.msk.f32.gmra.mxu0 %vm293_vm0, %v5602_v28  ;;  %4954 = vmatprep.mubr.msk.f32.mxu1 %vm293_vm0, %v5792_v15  ;;  %v4225_v28 = vld [vmem:[%s6969_s1 + $0x128] sm:$0xff] }
  0x8b   : > { %5014 = vmatprep.mubr.msk.f32.mxu0 %vm293_vm0, %v5608_v30  ;;  %5058 = vmatpush3.msra.mxu1 %v4157_v13  ;;  %v4154_v30 = vld [vmem:[%s6969_s1 + $0xf0] sm:$0xff] }
  0x8c   : > { %5118 = vmatpush3.msra.mxu0 %v4227_v16  ;;  %5059 = vmatprep.subr.mxu1 %v4156_v18  ;;  %v7061_v16 = vld [vmem:[#allocation27_spill] sm:$0xff] }
  0x8d   : > { %4955 = vmatmul.mubr.msk.f32.gmra.mxu1 %vm293_vm0, %v5807_v25  ;;  %5119 = vmatprep.subr.mxu0 %v4226_v22 }
  0x8e   : > { %5015 = vmatmul.mubr.msk.f32.gmra.mxu0 %vm293_vm0, %v5628_v34  ;;  %4957 = vmatprep.mubr.msk.f32.mxu1 %vm293_vm0, %v5818_v32  ;;  %v4224_v34 = vld [vmem:[%s6969_s1 + $0x120] sm:$0xff] }
  0x8f   : > { %5017 = vmatprep.mubr.msk.f32.mxu0 %vm293_vm0, %v5634_v36  ;;  %5060 = vmatpush3.msra.mxu1 %v4156_v18  ;;  %v4299_v36 = vld [vmem:[%s6969_s1 + $0x178] sm:$0xff] }
  0x90   : > { %5120 = vmatpush3.msra.mxu0 %v4226_v22  ;;  %5061 = vmatprep.subr.mxu1 %v4155_v24 }
  0x91   : > { %4958 = vmatmul.mubr.msk.f32.gmra.mxu1 %vm293_vm0, %v5833_v43  ;;  %5121 = vmatprep.subr.mxu0 %v4225_v28 }
  0x92   : > { %5018 = vmatmul.mubr.msk.f32.gmra.mxu0 %vm293_vm0, %v5654_v40  ;;  %4960 = vmatprep.mubr.msk.f32.mxu1 %vm293_vm0, %v5844_v52  ;;  %v4369_v40 = vld [vmem:[%s6969_s1 + $0x1a8] sm:$0xff] }
  0x93   : > { %5020 = vmatprep.mubr.msk.f32.mxu0 %vm293_vm0, %v5660_v42  ;;  %5062 = vmatpush3.msra.mxu1 %v4155_v24  ;;  %v4367_v42 = vld [vmem:[%s6969_s1 + $0x198] sm:$0xff] }
  0x94   : > { %5122 = vmatpush3.msra.mxu0 %v4225_v28  ;;  %5063 = vmatprep.subr.mxu1 %v4154_v30  ;;  %v7063_v28 = vld [vmem:[#allocation29_spill] sm:$0xff] }
  0x95   : > { %4961 = vmatmul.mubr.msk.f32.gmra.mxu1 %vm293_vm0, %v5861_v55  ;;  %5123 = vmatprep.subr.mxu0 %v4224_v34 }
  0x96   : > { %5021 = vmatmul.mubr.msk.f32.gmra.mxu0 %vm293_vm0, %v5680_v46  ;;  %4963 = vmatprep.mubr.msk.f32.mxu1 %vm293_vm0, %v5874_v0  ;;  %v4296_v46 = vld [vmem:[%s6969_s1 + $0x160] sm:$0xff] }
  0x97   : > { %5023 = vmatprep.mubr.msk.f32.mxu0 %vm293_vm0, %v5686_v48  ;;  %5064 = vmatpush3.msra.mxu1 %v4154_v30  ;;  %v4366_v48 = vld [vmem:[%s6969_s1 + $0x190] sm:$0xff] }
  0x98   : > { %5124 = vmatpush3.msra.mxu0 %v4224_v34  ;;  %5173 = vmatprep.subr.mxu1 %v4299_v36 }
  0x99   : > { %4964 = vmatmul.mubr.msk.f32.gmra.mxu1 %vm293_vm0, %v5888_v7  ;;  %5233 = vmatprep.subr.mxu0 %v4369_v40 }
  0x9a   : > { %5024 = vmatmul.mubr.msk.f32.gmra.mxu0 %vm293_vm0, %v5703_v51  ;;  %4966 = vmatprep.mubr.msk.f32.mxu1 %vm293_vm0, %v5896_v20  ;;  %v4295_v51 = vld [vmem:[%s6969_s1 + $0x158] sm:$0xff] }
  0x9b   : > { %5026 = vmatprep.mubr.msk.f32.mxu0 %vm293_vm0, %v5514_v6  ;;  %v6214_v6 = vld [vmem:[%s5508_s20 + $0x180] sm:$0xff] }
  0x9d   : > { %4967 = vmatmul.mubr.msk.f32.gmra.mxu1 %vm293_vm0, %v5908_v38 }
  0x9e   : > { %5027 = vmatmul.mubr.msk.f32.gmra.mxu0 %vm293_vm0, %v5518_v8  ;;  %4969 = vmatprep.mubr.msk.f32.mxu1 %vm293_vm0, %v5916_v2  ;;  %v6217_v8 = vld [vmem:[%s5508_s20 + $0x181] sm:$0xff] }
  0x9f   : > { %5029 = vmatprep.mubr.msk.f32.mxu0 %vm293_vm0, %v5531_v12  ;;  %v7039_v12 = vld [vmem:[#allocation5_spill] sm:$0xff] }
  0xa1   : > { %4970 = vmatmul.mubr.msk.f32.gmra.mxu1 %vm293_vm0, %v5928_v10 }
  0xa2   : > { %5030 = vmatmul.mubr.msk.f32.gmra.mxu0 %vm293_vm0, %v5540_v14  ;;  %4972 = vmatprep.mubr.msk.f32.mxu1 %vm293_vm0, %v5936_v53  ;;  %v6226_v14 = vld [vmem:[%s5508_s20 + $0x188] sm:$0xff] }
  0xa3   : > { %5032 = vmatprep.mubr.msk.f32.mxu0 %vm293_vm0, %v5551_v17  ;;  %v6231_v17 = vld [vmem:[%s5508_s20 + $0x189] sm:$0xff] }
  0xa5   : > { %4973 = vmatmul.mubr.msk.f32.gmra.mxu1 %vm293_vm0, %v5948_v44 }
  0xa6   : > { %5033 = vmatmul.mubr.msk.f32.gmra.mxu0 %vm293_vm0, %v5571_v21  ;;  %4975 = vmatprep.mubr.msk.f32.mxu1 %vm293_vm0, %v5956_v37  ;;  %v7040_v21 = vld [vmem:[#allocation6_spill] sm:$0xff] }
  0xa7   : > { %5035 = vmatprep.mubr.msk.f32.mxu0 %vm293_vm0, %v5579_v23  ;;  %v7041_v23 = vld [vmem:[#allocation7_spill] sm:$0xff] }
  0xa9   : > { %4976 = vmatmul.mubr.msk.f32.gmra.mxu1 %vm293_vm0, %v5968_v26 }
  0xaa   : > { %5036 = vmatmul.mubr.msk.f32.gmra.mxu0 %vm293_vm0, %v5597_v27  ;;  %4978 = vmatprep.mubr.msk.f32.mxu1 %vm293_vm0, %v5976_v19  ;;  %v4298_v27 = vld [vmem:[%s6969_s1 + $0x170] sm:$0xff] }
  0xab   : > { %5038 = vmatprep.mubr.msk.f32.mxu0 %vm293_vm0, %v5605_v29  ;;  %v4368_v29 = vld [vmem:[%s6969_s1 + $0x1a0] sm:$0xff] }
  0xad   : > { %4979 = vmatmul.mubr.msk.f32.gmra.mxu1 %vm293_vm0, %v5988_v60 }
  0xae   : > { %5039 = vmatmul.mubr.msk.f32.gmra.mxu0 %vm293_vm0, %v5623_v33  ;;  %4981 = vmatprep.mubr.msk.f32.mxu1 %vm293_vm0, %v5996_v5  ;;  %v7042_v33 = vld [vmem:[#allocation8_spill] sm:$0xff] }
  0xaf   : > { %5041 = vmatprep.mubr.msk.f32.mxu0 %vm293_vm0, %v5631_v35  ;;  %v7043_v35 = vld [vmem:[#allocation9_spill] sm:$0xff] }
  0xb1   : > { %4982 = vmatmul.mubr.msk.f32.gmra.mxu1 %vm293_vm0, %v6008_v49 }
  0xb2   : > { %5042 = vmatmul.mubr.msk.f32.gmra.mxu0 %vm293_vm0, %v5649_v39  ;;  %4984 = vmatprep.mubr.msk.f32.mxu1 %vm293_vm0, %v6016_v63  ;;  %v4297_v39 = vld [vmem:[%s6969_s1 + $0x168] sm:$0xff] }
  0xb3   : > { %5044 = vmatprep.mubr.msk.f32.mxu0 %vm293_vm0, %v5657_v41  ;;  %v7044_v41 = vld [vmem:[#allocation10_spill] sm:$0xff] }
  0xb5   : > { %4985 = vmatmul.mubr.msk.f32.gmra.mxu1 %vm293_vm0, %v6028_v31 }
  0xb6   : > { %5045 = vmatmul.mubr.msk.f32.gmra.mxu0 %vm293_vm0, %v5675_v45  ;;  %4987 = vmatprep.mubr.msk.f32.mxu1 %vm293_vm0, %v6036_v57  ;;  %v7045_v45 = vld [vmem:[#allocation11_spill] sm:$0xff] }
  0xb7   : > { %5047 = vmatprep.mubr.msk.f32.mxu0 %vm293_vm0, %v5683_v47  ;;  %v7046_v47 = vld [vmem:[#allocation12_spill] sm:$0xff] }
  0xb9   : > { %4988 = vmatmul.mubr.msk.f32.gmra.mxu1 %vm293_vm0, %v6048_v11 }
  0xba   : > { %5048 = vmatmul.mubr.msk.f32.gmra.mxu0 %vm293_vm0, %v7039_v12  ;;  %4990 = vmatprep.mubr.msk.f32.mxu1 %vm293_vm0, %v6214_v6 }
  0xbb   : > { %5050 = vmatprep.mubr.msk.f32.mxu0 %vm293_vm0, %v6217_v8 }
  0xbd   : > { %4991 = vmatmul.mubr.msk.f32.gmra.mxu1 %vm293_vm0, %v6226_v14 }
  0xbe   : > { %5051 = vmatmul.mubr.msk.f32.gmra.mxu0 %vm293_vm0, %v6231_v17  ;;  %5065 = vmatprep.mubr.msk.f32.mxu1 %vm293_vm0, %v7040_v21 }
  0xbf   : > { %5125 = vmatprep.mubr.msk.f32.mxu0 %vm293_vm0, %v5738_v62  ;;  %v4294_v62 = vld [vmem:[%s6969_s1 + $0x150] sm:$0xff] }
  0xc1   : > { %5066 = vmatmul.mubr.msk.f32.vlgmr.msra.gmra.mxu1 %vm293_vm0, %v7041_v23 }
  0xc2   : > { %5126 = vmatmul.mubr.msk.f32.vlgmr.msra.gmra.mxu0 %vm293_vm0, %v5755_v1  ;;  %5174 = vmatpush3.msra.mxu1 %v4299_v36  ;;  %v7050_v1 = vld [vmem:[#allocation16_spill] sm:$0xff] }
  0xc3   : > { %5068 = vmatprep.mubr.msk.f32.mxu1 %vm293_vm0, %v7042_v33  ;;  %5234 = vmatpush3.msra.mxu0 %v4369_v40  ;;  %v7065_v40 = vld [vmem:[#allocation31_spill] sm:$0xff] }
  0xc4   : > { %5128 = vmatprep.mubr.msk.f32.mxu0 %vm293_vm0, %v5766_v4  ;;  %5175 = vmatprep.subr.mxu1 %v4298_v27  ;;  %v4364_v4 = vld [vmem:[%s6969_s1 + $0x180] sm:$0xff] }
  0xc5   : > { %5069 = vmatmul.mubr.msk.f32.gmra.mxu1 %vm293_vm0, %v7043_v35  ;;  %5235 = vmatprep.subr.mxu0 %v4368_v29 }
  0xc6   : > { %5129 = vmatmul.mubr.msk.f32.gmra.mxu0 %vm293_vm0, %v5781_v9  ;;  %5071 = vmatprep.mubr.msk.f32.mxu1 %vm293_vm0, %v7044_v41  ;;  %v7051_v9 = vld [vmem:[#allocation17_spill] sm:$0xff] }
  0xc7   : > { %5131 = vmatprep.mubr.msk.f32.mxu0 %vm293_vm0, %v5792_v15  ;;  %5176 = vmatpush3.msra.mxu1 %v4298_v27  ;;  %v7052_v15 = vld [vmem:[#allocation18_spill] sm:$0xff] }
  0xc8   : > { %5236 = vmatpush3.msra.mxu0 %v4368_v29  ;;  %5177 = vmatprep.subr.mxu1 %v4297_v39 }
  0xc9   : > { %5072 = vmatmul.mubr.msk.f32.gmra.mxu1 %vm293_vm0, %v7045_v45  ;;  %5237 = vmatprep.subr.mxu0 %v4367_v42 }
  0xca   : > { %5132 = vmatmul.mubr.msk.f32.gmra.mxu0 %vm293_vm0, %v5807_v25  ;;  %5074 = vmatprep.mubr.msk.f32.mxu1 %vm293_vm0, %v7046_v47  ;;  %v7053_v25 = vld [vmem:[#allocation19_spill] sm:$0xff] }
  0xcb   : > { %5134 = vmatprep.mubr.msk.f32.mxu0 %vm293_vm0, %v5818_v32  ;;  %5178 = vmatpush3.msra.mxu1 %v4297_v39  ;;  %v7054_v32 = vld [vmem:[#allocation20_spill] sm:$0xff] }
  0xcc   : > { %5238 = vmatpush3.msra.mxu0 %v4367_v42  ;;  %5179 = vmatprep.subr.mxu1 %v4296_v46 }
  0xcd   : > { %5075 = vmatmul.mubr.msk.f32.gmra.mxu1 %vm293_vm0, %v7047_v50  ;;  %5239 = vmatprep.subr.mxu0 %v4366_v48  ;;  %v4262_v50 = vld [vmem:[%s5508_s20 + $0x31] sm:$0xff] }
  0xce   : > { %5135 = vmatmul.mubr.msk.f32.gmra.mxu0 %vm293_vm0, %v5833_v43  ;;  %5077 = vmatprep.mubr.msk.f32.mxu1 %vm293_vm0, %v7048_v56  ;;  %v7055_v43 = vld [vmem:[#allocation21_spill] sm:$0xff] }
  0xcf   : > { %5137 = vmatprep.mubr.msk.f32.mxu0 %vm293_vm0, %v5844_v52  ;;  %5180 = vmatpush3.msra.mxu1 %v4296_v46  ;;  %v7056_v52 = vld [vmem:[#allocation22_spill] sm:$0xff] }
  0xd0   : > { %5240 = vmatpush3.msra.mxu0 %v4366_v48  ;;  %5181 = vmatprep.subr.mxu1 %v4295_v51  ;;  %v7068_v46 = vld [vmem:[#allocation34_spill] sm:$0xff]  ;;  %v4223_v48 = vld [vmem:[%s5508_s20 + $0x1a0] sm:$0xff] }
  0xd1   : > { %5078 = vmatmul.mubr.msk.f32.gmra.mxu1 %vm293_vm0, %v7049_v61  ;;  %5241 = vmatprep.subr.mxu0 %v4365_v59 }
  0xd2   : > { %5138 = vmatmul.mubr.msk.f32.gmra.mxu0 %vm293_vm0, %v5861_v55  ;;  %5080 = vmatprep.mubr.msk.f32.mxu1 %vm293_vm0, %v7050_v1  ;;  %v7057_v55 = vld [vmem:[#allocation23_spill] sm:$0xff] }
  0xd3   : > { %5140 = vmatprep.mubr.msk.f32.mxu0 %vm293_vm0, %v5874_v0  ;;  %5182 = vmatpush3.msra.mxu1 %v4295_v51  ;;  %v7058_v0 = vld [vmem:[#allocation24_spill] sm:$0xff] }
  0xd4   : > { %5242 = vmatpush3.msra.mxu0 %v4365_v59  ;;  %5183 = vmatprep.subr.mxu1 %v4294_v62  ;;  %v4263_v59 = vld [vmem:[%s5508_s20 + $0x39] sm:$0xff] }
  0xd5   : > { %5081 = vmatmul.mubr.msk.f32.gmra.mxu1 %vm293_vm0, %v7051_v9  ;;  %5243 = vmatprep.subr.mxu0 %v4364_v4 }
  0xd6   : > { %5141 = vmatmul.mubr.msk.f32.gmra.mxu0 %vm293_vm0, %v5888_v7  ;;  %5083 = vmatprep.mubr.msk.f32.mxu1 %vm293_vm0, %v7052_v15 }
  0xd7   : > { %5143 = vmatprep.mubr.msk.f32.mxu0 %vm293_vm0, %v5896_v20  ;;  %5184 = vmatpush3.msra.mxu1 %v4294_v62  ;;  %v4264_v62 = vld [vmem:[%s5508_s20 + $0x49] sm:$0xff] }
  0xd8   : > { %5244 = vmatpush3.msra.mxu0 %v4364_v4 }
  0xd9   : > { %5084 = vmatmul.mubr.msk.f32.gmra.mxu1 %vm293_vm0, %v7053_v25  ;;  %v4265_v25 = vld [vmem:[%s5508_s20 + $0x51] sm:$0xff] }
  0xda   : > { %5144 = vmatmul.mubr.msk.f32.gmra.mxu0 %vm293_vm0, %v5908_v38  ;;  %5086 = vmatprep.mubr.msk.f32.mxu1 %vm293_vm0, %v7054_v32  ;;  %v7060_v38 = vld [vmem:[#allocation26_spill] sm:$0xff] }
  0xdb   : > { %5146 = vmatprep.mubr.msk.f32.mxu0 %vm293_vm0, %v5916_v2 }
  0xdd   : > { %5087 = vmatmul.mubr.msk.f32.gmra.mxu1 %vm293_vm0, %v7055_v43 }
  0xde   : > { %5147 = vmatmul.mubr.msk.f32.gmra.mxu0 %vm293_vm0, %v5928_v10  ;;  %5089 = vmatprep.mubr.msk.f32.mxu1 %vm293_vm0, %v7056_v52  ;;  %v7059_v10 = vld [vmem:[#allocation25_spill] sm:$0xff] }
  0xdf   : > { %5149 = vmatprep.mubr.msk.f32.mxu0 %vm293_vm0, %v5936_v53 }
  0xe1   : > { %v6335_v54 = vpop.f32.mrf.mxu1  ;;  %5090 = vmatmul.mubr.msk.f32.gmra.mxu1 %vm293_vm0, %v7057_v55 }
  0xe2   : > { %v6339_v58 = vpop.f32.mrf.mxu0  ;;  %5150 = vmatmul.mubr.msk.f32.gmra.mxu0 %vm293_vm0, %v5948_v44  ;;  %5092 = vmatprep.mubr.msk.f32.mxu1 %vm293_vm0, %v7058_v0 }
  0xe3   : > { %v6345_v2 = vpop.f32.mrf.mxu1  ;;  %5152 = vmatprep.mubr.msk.f32.mxu0 %vm293_vm0, %v5956_v37 }
  0xe4   : > { %v6349_v7 = vpop.f32.mrf.mxu0 }
  0xe5   : > { %v6351_v53 = vpop.f32.mrf.mxu1  ;;  %5093 = vmatmul.mubr.msk.f32.gmra.mxu1 %vm293_vm0, %v7059_v10 }
  0xe6   : > { %v6355_v20 = vpop.f32.mrf.mxu0  ;;  %5153 = vmatmul.mubr.msk.f32.gmra.mxu0 %vm293_vm0, %v5968_v26  ;;  %5095 = vmatprep.mubr.msk.f32.mxu1 %vm293_vm0, %v7060_v38  ;;  %v7062_v26 = vld [vmem:[#allocation28_spill] sm:$0xff] }
  0xe7   : > { %v6361_v44 = vpop.f32.mrf.mxu1  ;;  %5155 = vmatprep.mubr.msk.f32.mxu0 %vm293_vm0, %v5976_v19 }
  0xe8   : > { %v6365_v37 = vpop.f32.mrf.mxu0 }
  0xe9   : > { %v6367_v13 = vpop.f32.mrf.mxu1  ;;  %5096 = vmatmul.mubr.msk.f32.gmra.mxu1 %vm293_vm0, %v7061_v16 }
  0xea   : > { %v6371_v18 = vpop.f32.mrf.mxu0  ;;  %5156 = vmatmul.mubr.msk.f32.gmra.mxu0 %vm293_vm0, %v5988_v60  ;;  %5098 = vmatprep.mubr.msk.f32.mxu1 %vm293_vm0, %v7062_v26  ;;  %v7064_v60 = vld [vmem:[#allocation30_spill] sm:$0xff]  ;;  %v4268_v26 = vld [vmem:[%s5508_s20 + $0x79] sm:$0xff] }
  0xeb   : > { %v6377_v22 = vpop.f32.mrf.mxu1  ;;  %5158 = vmatprep.mubr.msk.f32.mxu0 %vm293_vm0, %v5996_v5 }
  0xec   : > { %v6381_v19 = vpop.f32.mrf.mxu0 }
  0xed   : > { %v6383_v24 = vpop.f32.mrf.mxu1  ;;  %5099 = vmatmul.mubr.msk.f32.gmra.mxu1 %vm293_vm0, %v7063_v28 }
  0xee   : > { %v6387_v30 = vpop.f32.mrf.mxu0  ;;  %5159 = vmatmul.mubr.msk.f32.gmra.mxu0 %vm293_vm0, %v6008_v49  ;;  %5101 = vmatprep.mubr.msk.f32.mxu1 %vm293_vm0, %v7064_v60  ;;  %v7066_v49 = vld [vmem:[#allocation32_spill] sm:$0xff] }
  0xef   : > { %v6393_v34 = vpop.f32.mrf.mxu1  ;;  %5161 = vmatprep.mubr.msk.f32.mxu0 %vm293_vm0, %v6016_v63 }
  0xf0   : > { %v6397_v5 = vpop.f32.mrf.mxu0 }
  0xf1   : > { %v6399_v36 = vpop.f32.mrf.mxu1  ;;  %5102 = vmatmul.mubr.msk.f32.gmra.mxu1 %vm293_vm0, %v7065_v40  ;;  %v4338_v40 = vld [vmem:[%s5508_s20 + $0x7a] sm:$0xff] }
  0xf2   : > { %v6403_v12 = vpop.f32.mrf.mxu0  ;;  %5162 = vmatmul.mubr.msk.f32.gmra.mxu0 %vm293_vm0, %v6028_v31  ;;  %5104 = vmatprep.mubr.msk.f32.mxu1 %vm293_vm0, %v7066_v49  ;;  %v7067_v31 = vld [vmem:[#allocation33_spill] sm:$0xff] }
  0xf3   : > { %v6409_v21 = vpop.f32.mrf.mxu1  ;;  %5164 = vmatprep.mubr.msk.f32.mxu0 %vm293_vm0, %v6036_v57  ;;  %v6430_v57 = vld [vmem:[%s5508_s20 + $0x182] sm:$0xff] }
  0xf4   : > { %v6413_v63 = vpop.f32.mrf.mxu0 }
  0xf5   : > { %v6415_v23 = vpop.f32.mrf.mxu1  ;;  %5105 = vmatmul.mubr.msk.f32.gmra.mxu1 %vm293_vm0, %v6033_v3  ;;  %v4222_v3 = vld [vmem:[%s5508_s20 + $0x198] sm:$0xff] }
  0xf6   : > { %v6419_v27 = vpop.f32.mrf.mxu0  ;;  %5165 = vmatmul.mubr.msk.f32.gmra.mxu0 %vm293_vm0, %v6048_v11  ;;  %5107 = vmatprep.mubr.msk.f32.mxu1 %vm293_vm0, %v7067_v31 }
  0xf7   : > { %v6425_v29 = vpop.f32.mrf.mxu1  ;;  %5167 = vmatprep.mubr.msk.f32.mxu0 %vm293_vm0, %v6214_v6  ;;  %v6446_v6 = vld [vmem:[%s5508_s20 + $0x18a] sm:$0xff] }
  0xf8   : > { %v6432_v39 = vpop.f32.mrf.mxu0 }
  0xf9   : > { %v6435_v42 = vpop.f32.mrf.mxu1  ;;  %5108 = vmatmul.mubr.msk.f32.gmra.mxu1 %vm293_vm0, %v7068_v46  ;;  %v4269_v46 = vld [vmem:[%s5508_s20 + $0x81] sm:$0xff] }
  0xfa   : > { %v6439_v11 = vpop.f32.mrf.mxu0  ;;  %5168 = vmatmul.mubr.msk.f32.gmra.mxu0 %vm293_vm0, %v6226_v14  ;;  %5110 = vmatprep.mubr.msk.f32.mxu1 %vm293_vm0, %v6430_v57 }
  0xfb   : > { %v6448_v47 = vpop.f32.mrf.mxu1  ;;  %5170 = vmatprep.mubr.msk.f32.mxu0 %vm293_vm0, %v4222_v3 }
  0xfc   : > { %v6453_v51 = vpop.f32.mrf.mxu0 }
  0xfd   : > { %v6455_v56 = vpop.f32.mrf.mxu1  ;;  %5111 = vmatmul.mubr.msk.f32.gmra.mxu1 %vm293_vm0, %v6446_v6 }
  0xfe   : > { %v6459_v14 = vpop.f32.mrf.mxu0  ;;  %5171 = vmatmul.mubr.msk.f32.gmra.mxu0 %vm293_vm0, %v4223_v48  ;;  %5185 = vmatprep.mubr.msk.f32.mxu1 %vm293_vm0, %v4262_v50  ;;  %v4270_v50 = vld [vmem:[%s5508_s20 + $0x91] sm:$0xff] }
  0xff   : > { %v6464_v61 = vpop.f32.mrf.mxu1  ;;  %5245 = vmatprep.mubr.msk.f32.mxu0 %vm293_vm0, %v7042_v33  ;;  %v4266_v33 = vld [vmem:[%s5508_s20 + $0x61] sm:$0xff] }
 0x100   : > { %v6469_v1 = vpop.f32.mrf.mxu0 }
 0x101   : > { %v4827_v4 = vpop.f32.mrf.mxu1  ;;  %5186 = vmatmul.mubr.msk.f32.vlgmr.msra.gmra.mxu1 %vm293_vm0, %v4263_v59 }
 0x102   : > { %v783_v9 = vadd.f32 %v4827_v4, %v6339_v58  ;;  %v4887_v15 = vpop.f32.mrf.mxu0  ;;  %5246 = vmatmul.mubr.msk.f32.vlgmr.msra.gmra.mxu0 %vm293_vm0, %v7043_v35  ;;  %5188 = vmatprep.mubr.msk.f32.mxu1 %vm293_vm0, %v4264_v62  ;;  %v4336_v58 = vld [vmem:[%s5508_s20 + $0x62] sm:$0xff] }
 0x103   : > { %v777_v32 = vpop.f32.mrf.mxu1  ;;  %5248 = vmatprep.mubr.msk.f32.mxu0 %vm293_vm0, %v7044_v41  ;;  %v4267_v41 = vld [vmem:[%s5508_s20 + $0x69] sm:$0xff] }
 0x104   : > { %v6480_v43 = vadd.f32 %v4887_v15, %v783_v9  ;;  %v778_v52 = vadd.f32 %v777_v32, %v6349_v7  ;;  %v1137_v55 = vpop.f32.mrf.mxu0  ;;  %v4337_v7 = vld [vmem:[%s5508_s20 + $0x6a] sm:$0xff] }
 0x105   : > { %v4830_v0 = vpop.f32.mrf.mxu1  ;;  %5189 = vmatmul.mubr.msk.f32.gmra.mxu1 %vm293_vm0, %v4265_v25 }
 0x106   : > { %v6485_v35 = vadd.f32 %v1137_v55, %v778_v52  ;;  %v793_v10 = vadd.f32 %v4830_v0, %v6355_v20  ;;  %v4890_v38 = vpop.f32.mrf.mxu0  ;;  %5249 = vmatmul.mubr.msk.f32.gmra.mxu0 %vm293_vm0, %v7045_v45  ;;  %5191 = vmatprep.mubr.msk.f32.mxu1 %vm293_vm0, %v4266_v33  ;;  %v4271_v33 = vld [vmem:[%s5508_s20 + $0x99] sm:$0xff]  ;;  %v4272_v55 = vld [vmem:[%s5508_s20 + $0xa9] sm:$0xff] }
 0x107   : > { %v787_v16 = vpop.f32.mrf.mxu1  ;;  %5251 = vmatprep.mubr.msk.f32.mxu0 %vm293_vm0, %v4336_v58 }
 0x108   : > { %v6495_v28 = vadd.f32 %v4890_v38, %v793_v10  ;;  %v788_v60 = vadd.f32 %v787_v16, %v6365_v37  ;;  %v1147_v20 = vpop.f32.mrf.mxu0  ;;  %v4339_v37 = vld [vmem:[%s5508_s20 + $0x82] sm:$0xff] }
 0x109   : > { %v4833_v49 = vpop.f32.mrf.mxu1  ;;  %5192 = vmatmul.mubr.msk.f32.gmra.mxu1 %vm293_vm0, %v4267_v41 }
 0x10a   : > { %v6500_v45 = vadd.f32 %v1147_v20, %v788_v60  ;;  %v803_v31 = vadd.f32 %v4833_v49, %v6371_v18  ;;  %v4893_v3 = vpop.f32.mrf.mxu0  ;;  %5252 = vmatmul.mubr.msk.f32.gmra.mxu0 %vm293_vm0, %v4337_v7  ;;  %5194 = vmatprep.mubr.msk.f32.mxu1 %vm293_vm0, %v4268_v26  ;;  %v4340_v18 = vld [vmem:[%s5508_s20 + $0x92] sm:$0xff]  ;;  %v4274_v20 = vld [vmem:[%s5508_s20 + $0xc1] sm:$0xff] }
 0x10b   : > { %v797_v48 = vpop.f32.mrf.mxu1  ;;  %5254 = vmatprep.mubr.msk.f32.mxu0 %vm293_vm0, %v4338_v40  ;;  %v4273_v26 = vld [vmem:[%s5508_s20 + $0xb1] sm:$0xff] }
 0x10c   : > { %v6509_v59 = vadd.f32 %v4893_v3, %v803_v31  ;;  %v798_v62 = vadd.f32 %v797_v48, %v6381_v19  ;;  %v1157_v4 = vpop.f32.mrf.mxu0  ;;  %v4341_v19 = vld [vmem:[%s5508_s20 + $0x9a] sm:$0xff] }
 0x10d   : > { %v4836_v9 = vpop.f32.mrf.mxu1  ;;  %5195 = vmatmul.mubr.msk.f32.gmra.mxu1 %vm293_vm0, %v4269_v46 }
 0x10e   : > { %v6514_v15 = vadd.f32 %v1157_v4, %v798_v62  ;;  %v813_v25 = vadd.f32 %v4836_v9, %v6387_v30  ;;  %v4896_v32 = vpop.f32.mrf.mxu0  ;;  %5255 = vmatmul.mubr.msk.f32.gmra.mxu0 %vm293_vm0, %v4339_v37  ;;  %5197 = vmatprep.mubr.msk.f32.mxu1 %vm293_vm0, %v4270_v50  ;;  %v4342_v30 = vld [vmem:[%s5508_s20 + $0xaa] sm:$0xff]  ;;  %v4276_v4 = vld [vmem:[%s5508_s20 + $0xd9] sm:$0xff] }
 0x10f   : > { %v807_v52 = vpop.f32.mrf.mxu1  ;;  %5257 = vmatprep.mubr.msk.f32.mxu0 %vm293_vm0, %v4340_v18  ;;  %v4275_v50 = vld [vmem:[%s5508_s20 + $0xc9] sm:$0xff] }
 0x110   : > { %v6523_v58 = vadd.f32 %v4896_v32, %v813_v25  ;;  %v808_v0 = vadd.f32 %v807_v52, %v6397_v5  ;;  %v1167_v10 = vpop.f32.mrf.mxu0  ;;  %v4343_v5 = vld [vmem:[%s5508_s20 + $0xb2] sm:$0xff] }
 0x111   : > { %v4839_v38 = vpop.f32.mrf.mxu1  ;;  %5198 = vmatmul.mubr.msk.f32.gmra.mxu1 %vm293_vm0, %v4271_v33 }
 0x112   : > { %v6528_v41 = vadd.f32 %v1167_v10, %v808_v0  ;;  %v823_v16 = vadd.f32 %v4839_v38, %v6403_v12  ;;  %v4899_v7 = vpop.f32.mrf.mxu0  ;;  %5258 = vmatmul.mubr.msk.f32.gmra.mxu0 %vm293_vm0, %v4341_v19  ;;  %5200 = vmatprep.mubr.msk.f32.mxu1 %vm293_vm0, %v4272_v55  ;;  %v4344_v12 = vld [vmem:[%s5508_s20 + $0xc2] sm:$0xff]  ;;  %v4278_v10 = vld [vmem:[%s5508_s20 + $0xf1] sm:$0xff] }
 0x113   : > { %v817_v60 = vpop.f32.mrf.mxu1  ;;  %5260 = vmatprep.mubr.msk.f32.mxu0 %vm293_vm0, %v4342_v30  ;;  %v4277_v55 = vld [vmem:[%s5508_s20 + $0xe1] sm:$0xff] }
 0x114   : > { %v6537_v40 = vadd.f32 %v4899_v7, %v823_v16  ;;  %v818_v49 = vadd.f32 %v817_v60, %v6413_v63  ;;  %v1177_v31 = vpop.f32.mrf.mxu0  ;;  %v4345_v63 = vld [vmem:[%s5508_s20 + $0xca] sm:$0xff] }
 0x115   : > { %v4842_v3 = vpop.f32.mrf.mxu1  ;;  %5201 = vmatmul.mubr.msk.f32.gmra.mxu1 %vm293_vm0, %v4273_v26 }
 0x116   : > { %v6542_v46 = vadd.f32 %v1177_v31, %v818_v49  ;;  %v833_v48 = vadd.f32 %v4842_v3, %v6419_v27  ;;  %v4902_v37 = vpop.f32.mrf.mxu0  ;;  %5261 = vmatmul.mubr.msk.f32.gmra.mxu0 %vm293_vm0, %v4343_v5  ;;  %5203 = vmatprep.mubr.msk.f32.mxu1 %vm293_vm0, %v4274_v20  ;;  %v4346_v27 = vld [vmem:[%s5508_s20 + $0xda] sm:$0xff]  ;;  %v4280_v31 = vld [vmem:[%s5508_s20 + $0x109] sm:$0xff] }
 0x117   : > { %v827_v62 = vpop.f32.mrf.mxu1  ;;  %5263 = vmatprep.mubr.msk.f32.mxu0 %vm293_vm0, %v4344_v12  ;;  %v4279_v20 = vld [vmem:[%s5508_s20 + $0xf9] sm:$0xff] }
 0x118   : > { %v6551_v18 = vadd.f32 %v4902_v37, %v833_v48  ;;  %v828_v9 = vadd.f32 %v827_v62, %v6432_v39  ;;  %v1187_v25 = vpop.f32.mrf.mxu0  ;;  %v4347_v39 = vld [vmem:[%s5508_s20 + $0xe2] sm:$0xff] }
 0x119   : > { %v4845_v32 = vpop.f32.mrf.mxu1  ;;  %5204 = vmatmul.mubr.msk.f32.gmra.mxu1 %vm293_vm0, %v4275_v50 }
 0x11a   : > { %v6556_v33 = vadd.f32 %v1187_v25, %v828_v9  ;;  %v843_v52 = vadd.f32 %v4845_v32, %v6439_v11  ;;  %v4905_v19 = vpop.f32.mrf.mxu0  ;;  %5264 = vmatmul.mubr.msk.f32.gmra.mxu0 %vm293_vm0, %v4345_v63  ;;  %5206 = vmatprep.mubr.msk.f32.mxu1 %vm293_vm0, %v4276_v4  ;;  %v4348_v11 = vld [vmem:[%s5508_s20 + $0xf2] sm:$0xff]  ;;  %v4282_v25 = vld [vmem:[%s5508_s20 + $0x121] sm:$0xff] }
 0x11b   : > { %v837_v0 = vpop.f32.mrf.mxu1  ;;  %5266 = vmatprep.mubr.msk.f32.mxu0 %vm293_vm0, %v4346_v27  ;;  %v4281_v4 = vld [vmem:[%s5508_s20 + $0x111] sm:$0xff] }
 0x11c   : > { %v6565_v30 = vadd.f32 %v4905_v19, %v843_v52  ;;  %v838_v38 = vadd.f32 %v837_v0, %v6453_v51  ;;  %v1197_v16 = vpop.f32.mrf.mxu0  ;;  %v4349_v51 = vld [vmem:[%s5508_s20 + $0xfa] sm:$0xff] }
 0x11d   : > { %v4848_v7 = vpop.f32.mrf.mxu1  ;;  %5207 = vmatmul.mubr.msk.f32.gmra.mxu1 %vm293_vm0, %v4277_v55 }
 0x11e   : > { %v6570_v26 = vadd.f32 %v1197_v16, %v838_v38  ;;  %v853_v60 = vadd.f32 %v4848_v7, %v6459_v14  ;;  %v4908_v5 = vpop.f32.mrf.mxu0  ;;  %5267 = vmatmul.mubr.msk.f32.gmra.mxu0 %vm293_vm0, %v4347_v39  ;;  %5209 = vmatprep.mubr.msk.f32.mxu1 %vm293_vm0, %v4278_v10  ;;  %v4350_v14 = vld [vmem:[%s5508_s20 + $0x10a] sm:$0xff]  ;;  %v4284_v16 = vld [vmem:[%s5508_s20 + $0x139] sm:$0xff] }
 0x11f   : > { %v847_v49 = vpop.f32.mrf.mxu1  ;;  %5269 = vmatprep.mubr.msk.f32.mxu0 %vm293_vm0, %v4348_v11  ;;  %v4283_v10 = vld [vmem:[%s5508_s20 + $0x129] sm:$0xff] }
 0x120   : > { %v6579_v12 = vadd.f32 %v4908_v5, %v853_v60  ;;  %v848_v3 = vadd.f32 %v847_v49, %v6469_v1  ;;  %v1207_v48 = vpop.f32.mrf.mxu0  ;;  %v4351_v1 = vld [vmem:[%s5508_s20 + $0x112] sm:$0xff] }
 0x121   : > { %v4851_v37 = vpop.f32.mrf.mxu1  ;;  %5210 = vmatmul.mubr.msk.f32.gmra.mxu1 %vm293_vm0, %v4279_v20 }
 0x122   : > { %v6584_v50 = vadd.f32 %v1207_v48, %v848_v3  ;;  %v863_v62 = vadd.f32 %v4851_v37, %v6335_v54  ;;  %v4911_v63 = vpop.f32.mrf.mxu0  ;;  %5270 = vmatmul.mubr.msk.f32.gmra.mxu0 %vm293_vm0, %v4349_v51  ;;  %5212 = vmatprep.mubr.msk.f32.mxu1 %vm293_vm0, %v4280_v31  ;;  %v4352_v54 = vld [vmem:[%s5508_s20 + $0x122] sm:$0xff]  ;;  %v4286_v48 = vld [vmem:[%s5508_s20 + $0x151] sm:$0xff] }
 0x123   : > { %v857_v9 = vpop.f32.mrf.mxu1  ;;  %5272 = vmatprep.mubr.msk.f32.mxu0 %vm293_vm0, %v4350_v14  ;;  %v4285_v31 = vld [vmem:[%s5508_s20 + $0x141] sm:$0xff] }
 0x124   : > { %v6593_v27 = vadd.f32 %v4911_v63, %v863_v62  ;;  %v858_v32 = vadd.f32 %v857_v9, %v6345_v2  ;;  %v1217_v52 = vpop.f32.mrf.mxu0  ;;  %v4353_v2 = vld [vmem:[%s5508_s20 + $0x12a] sm:$0xff] }
 0x125   : > { %v4854_v19 = vpop.f32.mrf.mxu1  ;;  %5213 = vmatmul.mubr.msk.f32.gmra.mxu1 %vm293_vm0, %v4281_v4 }
 0x126   : > { %v6598_v55 = vadd.f32 %v1217_v52, %v858_v32  ;;  %v873_v0 = vadd.f32 %v4854_v19, %v6351_v53  ;;  %v4914_v39 = vpop.f32.mrf.mxu0  ;;  %5273 = vmatmul.mubr.msk.f32.gmra.mxu0 %vm293_vm0, %v4351_v1  ;;  %5215 = vmatprep.mubr.msk.f32.mxu1 %vm293_vm0, %v4282_v25  ;;  %v4354_v53 = vld [vmem:[%s5508_s20 + $0x13a] sm:$0xff]  ;;  %v4288_v52 = vld [vmem:[%s5508_s20 + $0x169] sm:$0xff] }
 0x127   : > { %v867_v38 = vpop.f32.mrf.mxu1  ;;  %5275 = vmatprep.mubr.msk.f32.mxu0 %vm293_vm0, %v4352_v54  ;;  %v4287_v25 = vld [vmem:[%s5508_s20 + $0x159] sm:$0xff] }
 0x128   : > { %v6607_v11 = vadd.f32 %v4914_v39, %v873_v0  ;;  %v868_v7 = vadd.f32 %v867_v38, %v6361_v44  ;;  %v1227_v60 = vpop.f32.mrf.mxu0  ;;  %v4355_v44 = vld [vmem:[%s5508_s20 + $0x142] sm:$0xff]  ;;  %v4358_v39 = vld [vmem:[%s5508_s20 + $0x16a] sm:$0xff] }
 0x129   : > { %v4857_v5 = vpop.f32.mrf.mxu1  ;;  %5216 = vmatmul.mubr.msk.f32.gmra.mxu1 %vm293_vm0, %v4283_v10 }
 0x12a   : > { %v6612_v20 = vadd.f32 %v1227_v60, %v868_v7  ;;  %v883_v49 = vadd.f32 %v4857_v5, %v6367_v13  ;;  %v4917_v51 = vpop.f32.mrf.mxu0  ;;  %5276 = vmatmul.mubr.msk.f32.gmra.mxu0 %vm293_vm0, %v4353_v2  ;;  %5218 = vmatprep.mubr.msk.f32.mxu1 %vm293_vm0, %v4284_v16  ;;  %v4356_v13 = vld [vmem:[%s5508_s20 + $0x152] sm:$0xff] }
 0x12b   : > { %v877_v3 = vpop.f32.mrf.mxu1  ;;  %5278 = vmatprep.mubr.msk.f32.mxu0 %vm293_vm0, %v4354_v53  ;;  %v4289_v16 = vld [vmem:[%s5508_s20 + $0x171] sm:$0xff] }
 0x12c   : > { %v6621_v14 = vadd.f32 %v4917_v51, %v883_v49  ;;  %v878_v37 = vadd.f32 %v877_v3, %v6377_v22  ;;  %v1237_v62 = vpop.f32.mrf.mxu0  ;;  %v4357_v22 = vld [vmem:[%s5508_s20 + $0x15a] sm:$0xff] }
 0x12d   : > { %v4860_v63 = vpop.f32.mrf.mxu1  ;;  %5219 = vmatmul.mubr.msk.f32.gmra.mxu1 %vm293_vm0, %v4285_v31 }
 0x12e   : > { %v6626_v4 = vadd.f32 %v1237_v62, %v878_v37  ;;  %v893_v9 = vadd.f32 %v4860_v63, %v6383_v24  ;;  %v4920_v1 = vpop.f32.mrf.mxu0  ;;  %5279 = vmatmul.mubr.msk.f32.gmra.mxu0 %vm293_vm0, %v4355_v44  ;;  %5221 = vmatprep.mubr.msk.f32.mxu1 %vm293_vm0, %v4286_v48  ;;  %v4362_v62 = vld [vmem:[%s5508_s20 + $0x19a] sm:$0xff] }
 0x12f   : > { %v887_v32 = vpop.f32.mrf.mxu1  ;;  %5281 = vmatprep.mubr.msk.f32.mxu0 %vm293_vm0, %v4356_v13 }
 0x130   : > { %v6635_v54 = vadd.f32 %v4920_v1, %v893_v9  ;;  %v888_v19 = vadd.f32 %v887_v32, %v6393_v34  ;;  %v1247_v0 = vpop.f32.mrf.mxu0  ;;  %v4359_v34 = vld [vmem:[%s5508_s20 + $0x172] sm:$0xff] }
 0x131   : > { %v4863_v24 = vpop.f32.mrf.mxu1  ;;  %5222 = vmatmul.mubr.msk.f32.gmra.mxu1 %vm293_vm0, %v4287_v25 }
 0x132   : > { %v6640_v10 = vadd.f32 %v1247_v0, %v888_v19  ;;  %v903_v38 = vadd.f32 %v4863_v24, %v6399_v36  ;;  %v4923_v2 = vpop.f32.mrf.mxu0  ;;  %5282 = vmatmul.mubr.msk.f32.gmra.mxu0 %vm293_vm0, %v4357_v22  ;;  %5224 = vmatprep.mubr.msk.f32.mxu1 %vm293_vm0, %v4288_v52  ;;  %v5410_v19 = vmov 0   ;;  %v3746_v0 = vld [vmem:[%s6970_s2] sm:$0x3] }
 0x133   : > { %v897_v7 = vpop.f32.mrf.mxu1  ;;  %5284 = vmatprep.mubr.msk.f32.mxu0 %vm293_vm0, %v4358_v39  ;;  %5346 = vset.pattern.permute.xlu1 %v5410_v19 }
 0x134   : > { %v6648_v60 = vadd.f32 %v4923_v2, %v903_v38  ;;  %v898_v53 = vadd.f32 %v897_v7, %v6409_v21  ;;  %v1257_v5 = vpop.f32.mrf.mxu0  ;;  %v4292_v21 = vld [vmem:[%s5508_s20 + $0x199] sm:$0xff]  ;;  %3749 = vperm.xlu1 %5346, %v3746_v0  }
 0x135   : > { %v4866_v49 = vpop.f32.mrf.mxu1  ;;  %5225 = vmatmul.mubr.msk.f32.gmra.mxu1 %vm293_vm0, %v4289_v16 }
 0x136   : > { %v6652_v36 = vadd.f32 %v1257_v5, %v898_v53  ;;  %v913_v51 = vadd.f32 %v4866_v49, %v6415_v23  ;;  %v4926_v31 = vpop.f32.mrf.mxu0  ;;  %5285 = vmatmul.mubr.msk.f32.gmra.mxu0 %vm293_vm0, %v4359_v34  ;;  %5227 = vmatprep.mubr.msk.f32.mxu1 %vm293_vm0, %v6217_v8 }
 0x137   : > { %v907_v3 = vpop.f32.mrf.mxu1  ;;  %5287 = vmatprep.mubr.msk.f32.mxu0 %vm293_vm0, %v6430_v57  ;;  %v4293_v57 = vld [vmem:[%s5508_s20 + $0x1a1] sm:$0xff] }
 0x138   : > { %v6661_v44 = vadd.f32 %v4926_v31, %v913_v51  ;;  %v908_v48 = vadd.f32 %v907_v3, %v6425_v29  ;;  %v1267_v37 = vpop.f32.mrf.mxu0  ;;  %v4363_v29 = vld [vmem:[%s5508_s20 + $0x1a2] sm:$0xff]  ;;  %s5352_s20 = sshll.u32 %s5411_s6, 4  ;;  %s5353_s20 = int_to_ptr.vmem [resolvable:$false] %s5352_s20 }
 0x139   : > { %v4869_v23 = vpop.f32.mrf.mxu1  ;;  %5228 = vmatmul.mubr.msk.f32.gmra.mxu1 %vm293_vm0, %v6231_v17  ;;  %s5354_s19 = scalar_lea.vmem %s5353_s20, 128  ;;  %p5355_p0 = scmp.lt.s32.totalorder %s3796_s27, %s5353_s20 }
 0x13a   : > { %v6667_v13 = vadd.f32 %v1267_v37, %v908_v48  ;;  %v923_v8 = vadd.f32 %v4869_v23, %v6435_v42  ;;  %v4929_v63 = vpop.f32.mrf.mxu0  ;;  %5288 = vmatmul.mubr.msk.f32.gmra.mxu0 %vm293_vm0, %v6446_v6  ;;  %5230 = vmatprep.mubr.msk.f32.mxu1 %vm293_vm0, %v4292_v21  ;;  %p5356_p1 = scmp.lt.s32.totalorder %s5354_s19, %s5348_s5 }
 0x13b   : > { %v917_v9 = vpop.f32.mrf.mxu1  ;;  %5290 = vmatprep.mubr.msk.f32.mxu0 %vm293_vm0, %v4362_v62 }
 0x13c   : > { %v6676_v1 = vadd.f32 %v4929_v63, %v923_v8  ;;  %v918_v25 = vadd.f32 %v917_v9, %v6448_v47  ;;  %v1277_v17 = vpop.f32.mrf.mxu0  ;;  %p5357_p2 = por %p5356_p1, %p5355_p0 }
 0x13d   : > { %v4872_v32 = vpop.f32.mrf.mxu1  ;;  %5231 = vmatmul.mubr.msk.f32.gmra.mxu1 %vm293_vm0, %v4293_v57 }
 0x13e   : > { %v6680_v42 = vadd.f32 %v1277_v17, %v918_v25  ;;  %v933_v22 = vadd.f32 %v4872_v32, %v6455_v56  ;;  %v4932_v6 = vpop.f32.mrf.mxu0  ;;  %5291 = vmatmul.mubr.msk.f32.gmra.mxu0 %vm293_vm0, %v4363_v29  ;;  %p5358_p3 = pnand %p5357_p2, %p5351_p13 }
 0x13f   : > { %v927_v52 = vpop.f32.mrf.mxu1 }
 0x140   : > { %v6688_v47 = vadd.f32 %v4932_v6, %v933_v22  ;;  %v928_v39 = vadd.f32 %v927_v52, %v6464_v61  ;;  %v1287_v24 = vpop.f32.mrf.mxu0 }
 0x141   : > { %v4947_v38 = vpop.f32.mrf.mxu1 }
 0x142   : > { %v6691_v2 = vadd.f32 %v1287_v24, %v928_v39  ;;  %v1690_v56 = vadd.f32 %v4947_v38, %v6480_v43  ;;  %v5007_v16 = vpop.f32.mrf.mxu0 }
 0x143   : > { %v1530_v7 = vpop.f32.mrf.mxu1 }
 0x144   : > { %v6694_v34 = vadd.f32 %v5007_v16, %v1690_v56  ;;  %v1689_v53 = vadd.f32 %v1530_v7, %v6485_v35  ;;  %v1922_v5 = vpop.f32.mrf.mxu0 }
 0x145   : > { %v4950_v49 = vpop.f32.mrf.mxu1 }
 0x146   : > { %v6697_v51 = vadd.f32 %v1922_v5, %v1689_v53  ;;  %v1692_v31 = vadd.f32 %v4950_v49, %v6495_v28  ;;  %v5010_v61 = vpop.f32.mrf.mxu0 }
 0x147   : > { %v1540_v3 = vpop.f32.mrf.mxu1 }
 0x148   : > { %v6700_v21 = vadd.f32 %v5010_v61, %v1692_v31  ;;  %v1691_v48 = vadd.f32 %v1540_v3, %v6500_v45  ;;  %v1932_v37 = vpop.f32.mrf.mxu0 }
 0x149   : > { %v4953_v43 = vpop.f32.mrf.mxu1 }
 0x14a   : > { %v6703_v62 = vadd.f32 %v1932_v37, %v1691_v48  ;;  %v1694_v23 = vadd.f32 %v4953_v43, %v6509_v59  ;;  %v5013_v8 = vpop.f32.mrf.mxu0 }
 0x14b   : > { %v1550_v35 = vpop.f32.mrf.mxu1 }
 0x14c   : > { %v6706_v63 = vadd.f32 %v5013_v8, %v1694_v23  ;;  %v1693_v57 = vadd.f32 %v1550_v35, %v6514_v15  ;;  %v1942_v9 = vpop.f32.mrf.mxu0 }
 0x14d   : > { %v4956_v28 = vpop.f32.mrf.mxu1 }
 0x14e   : > { %v6709_v29 = vadd.f32 %v1942_v9, %v1693_v57  ;;  %v1696_v25 = vadd.f32 %v4956_v28, %v6523_v58  ;;  %v5016_v17 = vpop.f32.mrf.mxu0 }
 0x14f   : > { %v1560_v45 = vpop.f32.mrf.mxu1 }
 0x150   : > { %v6712_v32 = vadd.f32 %v5016_v17, %v1696_v25  ;;  %v1695_v22 = vadd.f32 %v1560_v45, %v6528_v41  ;;  %v1952_v6 = vpop.f32.mrf.mxu0 }
 0x151   : > { %v4959_v59 = vpop.f32.mrf.mxu1 }
 0x152   : > { %v6715_v52 = vadd.f32 %v1952_v6, %v1695_v22  ;;  %v1698_v0 = vadd.f32 %v4959_v59, %v6537_v40  ;;  %v5019_v39 = vpop.f32.mrf.mxu0 }
 0x153   : > { %v1570_v15 = vpop.f32.mrf.mxu1 }
 0x154   : > { %v6718_v24 = vadd.f32 %v5019_v39, %v1698_v0  ;;  %v1697_v38 = vadd.f32 %v1570_v15, %v6542_v46  ;;  %v1962_v56 = vpop.f32.mrf.mxu0 }
 0x155   : > { %v4962_v58 = vpop.f32.mrf.mxu1 }
 0x156   : > { %v6721_v16 = vadd.f32 %v1962_v56, %v1697_v38  ;;  %v1700_v7 = vadd.f32 %v4962_v58, %v6551_v18  ;;  %v5022_v53 = vpop.f32.mrf.mxu0 }
 0x157   : > { %v1580_v41 = vpop.f32.mrf.mxu1 }
 0x158   : > { %v6724_v5 = vadd.f32 %v5022_v53, %v1700_v7  ;;  %v1699_v49 = vadd.f32 %v1580_v41, %v6556_v33  ;;  %v1972_v31 = vpop.f32.mrf.mxu0 }
 0x159   : > { %v4965_v40 = vpop.f32.mrf.mxu1 }
 0x15a   : > { %v6727_v61 = vadd.f32 %v1972_v31, %v1699_v49  ;;  %v1702_v3 = vadd.f32 %v4965_v40, %v6565_v30  ;;  %v5025_v48 = vpop.f32.mrf.mxu0 }
 0x15b   : > { %v1590_v46 = vpop.f32.mrf.mxu1 }
 0x15c   : > { %v6730_v37 = vadd.f32 %v5025_v48, %v1702_v3  ;;  %v1701_v43 = vadd.f32 %v1590_v46, %v6570_v26  ;;  %v1982_v23 = vpop.f32.mrf.mxu0 }
 0x15d   : > { %v4968_v18 = vpop.f32.mrf.mxu1 }
 0x15e   : > { %v6733_v8 = vadd.f32 %v1982_v23, %v1701_v43  ;;  %v1704_v35 = vadd.f32 %v4968_v18, %v6579_v12  ;;  %v5028_v57 = vpop.f32.mrf.mxu0 }
 0x15f   : > { %v1600_v33 = vpop.f32.mrf.mxu1 }
 0x160   : > { %v6736_v9 = vadd.f32 %v5028_v57, %v1704_v35  ;;  %v1703_v28 = vadd.f32 %v1600_v33, %v6584_v50  ;;  %v1992_v25 = vpop.f32.mrf.mxu0 }
 0x161   : > { %v4971_v30 = vpop.f32.mrf.mxu1 }
 0x162   : > { %v6739_v17 = vadd.f32 %v1992_v25, %v1703_v28  ;;  %v1706_v45 = vadd.f32 %v4971_v30, %v6593_v27  ;;  %v5031_v22 = vpop.f32.mrf.mxu0 }
 0x163   : > { %v1610_v26 = vpop.f32.mrf.mxu1 }
 0x164   : > { %v6742_v6 = vadd.f32 %v5031_v22, %v1706_v45  ;;  %v1705_v59 = vadd.f32 %v1610_v26, %v6598_v55  ;;  %v2002_v0 = vpop.f32.mrf.mxu0 }
 0x165   : > { %v4974_v12 = vpop.f32.mrf.mxu1 }
 0x166   : > { %v6745_v39 = vadd.f32 %v2002_v0, %v1705_v59  ;;  %v1708_v15 = vadd.f32 %v4974_v12, %v6607_v11  ;;  %v5034_v38 = vpop.f32.mrf.mxu0 }
 0x167   : > { %v1620_v50 = vpop.f32.mrf.mxu1 }
 0x168   : > { %v6748_v56 = vadd.f32 %v5034_v38, %v1708_v15  ;;  %v1707_v58 = vadd.f32 %v1620_v50, %v6612_v20  ;;  %v2012_v7 = vpop.f32.mrf.mxu0 }
 0x169   : > { %v4977_v27 = vpop.f32.mrf.mxu1 }
 0x16a   : > { %v6751_v53 = vadd.f32 %v2012_v7, %v1707_v58  ;;  %v1710_v41 = vadd.f32 %v4977_v27, %v6621_v14  ;;  %v5037_v49 = vpop.f32.mrf.mxu0 }
 0x16b   : > { %v1630_v55 = vpop.f32.mrf.mxu1 }
 0x16c   : > { %v6754_v31 = vadd.f32 %v5037_v49, %v1710_v41  ;;  %v1709_v40 = vadd.f32 %v1630_v55, %v6626_v4  ;;  %v2022_v3 = vpop.f32.mrf.mxu0 }
 0x16d   : > { %v4980_v11 = vpop.f32.mrf.mxu1 }
 0x16e   : > { %v6757_v48 = vadd.f32 %v2022_v3, %v1709_v40  ;;  %v1712_v46 = vadd.f32 %v4980_v11, %v6635_v54  ;;  %v5040_v43 = vpop.f32.mrf.mxu0 }
 0x16f   : > { %v1640_v20 = vpop.f32.mrf.mxu1 }
 0x170   : > { %v6760_v23 = vadd.f32 %v5040_v43, %v1712_v46  ;;  %v1711_v18 = vadd.f32 %v1640_v20, %v6640_v10  ;;  %v2032_v35 = vpop.f32.mrf.mxu0 }
 0x171   : > { %v4983_v14 = vpop.f32.mrf.mxu1 }
 0x172   : > { %v6763_v57 = vadd.f32 %v2032_v35, %v1711_v18  ;;  %v1714_v33 = vadd.f32 %v4983_v14, %v6648_v60  ;;  %v5043_v28 = vpop.f32.mrf.mxu0 }
 0x173   : > { %v1650_v4 = vpop.f32.mrf.mxu1 }
 0x174   : > { %v6766_v25 = vadd.f32 %v5043_v28, %v1714_v33  ;;  %v1713_v30 = vadd.f32 %v1650_v4, %v6652_v36  ;;  %v2042_v45 = vpop.f32.mrf.mxu0 }
 0x175   : > { %v4986_v54 = vpop.f32.mrf.mxu1 }
 0x176   : > { %v6769_v22 = vadd.f32 %v2042_v45, %v1713_v30  ;;  %v1716_v26 = vadd.f32 %v4986_v54, %v6661_v44  ;;  %v5046_v59 = vpop.f32.mrf.mxu0 }
 0x177   : > { %v1660_v10 = vpop.f32.mrf.mxu1 }
 0x178   : > { %v6772_v0 = vadd.f32 %v5046_v59, %v1716_v26  ;;  %v1715_v12 = vadd.f32 %v1660_v10, %v6667_v13  ;;  %v2052_v15 = vpop.f32.mrf.mxu0 }
 0x179   : > { %v4989_v60 = vpop.f32.mrf.mxu1 }
 0x17a   : > { %v6775_v38 = vadd.f32 %v2052_v15, %v1715_v12  ;;  %v1718_v50 = vadd.f32 %v4989_v60, %v6676_v1  ;;  %v5049_v58 = vpop.f32.mrf.mxu0 }
 0x17b   : > { %v1670_v36 = vpop.f32.mrf.mxu1 }
 0x17c   : > { %v6778_v7 = vadd.f32 %v5049_v58, %v1718_v50  ;;  %v1717_v27 = vadd.f32 %v1670_v36, %v6680_v42  ;;  %v2062_v41 = vpop.f32.mrf.mxu0 }
 0x17d   : > { %v4992_v44 = vpop.f32.mrf.mxu1 }
 0x17e   : > { %v6781_v49 = vadd.f32 %v2062_v41, %v1717_v27  ;;  %v1720_v55 = vadd.f32 %v4992_v44, %v6688_v47  ;;  %v5052_v40 = vpop.f32.mrf.mxu0 }
 0x17f   : > { %v1680_v13 = vpop.f32.mrf.mxu1 }
 0x180   : > { %v6784_v3 = vadd.f32 %v5052_v40, %v1720_v55  ;;  %v1719_v11 = vadd.f32 %v1680_v13, %v6691_v2  ;;  %v2072_v46 = vpop.f32.mrf.mxu0 }
 0x181   : > { %v5067_v1 = vpop.f32.mrf.mxu1 }
 0x182   : > { %v6787_v43 = vadd.f32 %v2072_v46, %v1719_v11  ;;  %v2474_v20 = vadd.f32 %v5067_v1, %v6694_v34  ;;  %v5127_v18 = vpop.f32.mrf.mxu0 }
 0x183   : > { %v6790_v42 = vpop.f32.mrf.mxu1 }
 0x184   : > { %v6792_v35 = vadd.f32 %v5127_v18, %v2474_v20  ;;  %v6794_v14 = vpop.f32.mrf.mxu0 }
 0x185   : > { %v5070_v47 = vpop.f32.mrf.mxu1 }
 0x186   : > { %v2476_v33 = vadd.f32 %v5070_v47, %v6700_v21  ;;  %v5130_v28 = vpop.f32.mrf.mxu0 }
 0x187   : > { %v2324_v4 = vpop.f32.mrf.mxu1 }
 0x188   : > { %v6797_v30 = vadd.f32 %v5130_v28, %v2476_v33  ;;  %v2475_v2 = vadd.f32 %v2324_v4, %v6703_v62  ;;  %v2717_v45 = vpop.f32.mrf.mxu0 }
 0x189   : > { %v5073_v54 = vpop.f32.mrf.mxu1 }
 0x18a   : > { %v6800_v26 = vadd.f32 %v2717_v45, %v2475_v2  ;;  %v2478_v34 = vadd.f32 %v5073_v54, %v6706_v63  ;;  %v5133_v59 = vpop.f32.mrf.mxu0 }
 0x18b   : > { %v2334_v10 = vpop.f32.mrf.mxu1 }
 0x18c   : > { %v6803_v12 = vadd.f32 %v5133_v59, %v2478_v34  ;;  %v2477_v15 = vadd.f32 %v2334_v10, %v6709_v29  ;;  %v2727_v60 = vpop.f32.mrf.mxu0 }
 0x18d   : > { %v5076_v21 = vpop.f32.mrf.mxu1 }
 0x18e   : > { %v6806_v50 = vadd.f32 %v2727_v60, %v2477_v15  ;;  %v2480_v58 = vadd.f32 %v5076_v21, %v6712_v32  ;;  %v5136_v36 = vpop.f32.mrf.mxu0 }
 0x18f   : > { %v2344_v62 = vpop.f32.mrf.mxu1 }
 0x190   : > { %v6809_v27 = vadd.f32 %v5136_v36, %v2480_v58  ;;  %v2479_v41 = vadd.f32 %v2344_v62, %v6715_v52  ;;  %v2737_v44 = vpop.f32.mrf.mxu0 }
 0x191   : > { %v5079_v63 = vpop.f32.mrf.mxu1 }
 0x192   : > { %v6812_v55 = vadd.f32 %v2737_v44, %v2479_v41  ;;  %v2482_v40 = vadd.f32 %v5079_v63, %v6718_v24  ;;  %v5139_v13 = vpop.f32.mrf.mxu0 }
 0x193   : > { %v2354_v29 = vpop.f32.mrf.mxu1 }
 0x194   : > { %v6815_v11 = vadd.f32 %v5139_v13, %v2482_v40  ;;  %v2481_v46 = vadd.f32 %v2354_v29, %v6721_v16  ;;  %v2747_v1 = vpop.f32.mrf.mxu0 }
 0x195   : > { %v5082_v32 = vpop.f32.mrf.mxu1 }
 0x196   : > { %v6818_v20 = vadd.f32 %v2747_v1, %v2481_v46  ;;  %v2484_v18 = vadd.f32 %v5082_v32, %v6724_v5  ;;  %v5142_v47 = vpop.f32.mrf.mxu0 }
 0x197   : > { %v2364_v52 = vpop.f32.mrf.mxu1 }
 0x198   : > { %v6821_v33 = vadd.f32 %v5142_v47, %v2484_v18  ;;  %v2483_v28 = vadd.f32 %v2364_v52, %v6727_v61  ;;  %v2757_v4 = vpop.f32.mrf.mxu0 }
 0x199   : > { %v5085_v24 = vpop.f32.mrf.mxu1 }
 0x19a   : > { %v6824_v2 = vadd.f32 %v2757_v4, %v2483_v28  ;;  %v2486_v45 = vadd.f32 %v5085_v24, %v6730_v37  ;;  %v5145_v54 = vpop.f32.mrf.mxu0 }
 0x19b   : > { %v2374_v16 = vpop.f32.mrf.mxu1 }
 0x19c   : > { %v6827_v34 = vadd.f32 %v5145_v54, %v2486_v45  ;;  %v2485_v59 = vadd.f32 %v2374_v16, %v6733_v8  ;;  %v2767_v10 = vpop.f32.mrf.mxu0 }
 0x19d   : > { %v5088_v5 = vpop.f32.mrf.mxu1 }
 0x19e   : > { %v6830_v15 = vadd.f32 %v2767_v10, %v2485_v59  ;;  %v2488_v60 = vadd.f32 %v5088_v5, %v6736_v9  ;;  %v5148_v21 = vpop.f32.mrf.mxu0 }
 0x19f   : > { %v2384_v61 = vpop.f32.mrf.mxu1 }
 0x1a0   : > { %v6833_v58 = vadd.f32 %v5148_v21, %v2488_v60  ;;  %v2487_v36 = vadd.f32 %v2384_v61, %v6739_v17  ;;  %v2777_v62 = vpop.f32.mrf.mxu0 }
 0x1a1   : > { %v5091_v37 = vpop.f32.mrf.mxu1 }
 0x1a2   : > { %v6836_v41 = vadd.f32 %v2777_v62, %v2487_v36  ;;  %v2490_v44 = vadd.f32 %v5091_v37, %v6742_v6  ;;  %v5151_v63 = vpop.f32.mrf.mxu0 }
 0x1a3   : > { %v6839_v8 = vpop.f32.mrf.mxu1 }
 0x1a4   : > { %v6841_v40 = vadd.f32 %v5151_v63, %v2490_v44  ;;  %v6843_v13 = vpop.f32.mrf.mxu0 }
 0x1a5   : > { %v5094_v9 = vpop.f32.mrf.mxu1 }
 0x1a6   : > { %v2492_v29 = vadd.f32 %v5094_v9, %v6748_v56  ;;  %v5154_v46 = vpop.f32.mrf.mxu0 }
 0x1a7   : > { %v2404_v1 = vpop.f32.mrf.mxu1 }
 0x1a8   : > { %v6846_v32 = vadd.f32 %v5154_v46, %v2492_v29  ;;  %v2491_v17 = vadd.f32 %v2404_v1, %v6751_v53  ;;  %v2797_v18 = vpop.f32.mrf.mxu0 }
 0x1a9   : > { %v5097_v47 = vpop.f32.mrf.mxu1 }
 0x1aa   : > { %v6849_v52 = vadd.f32 %v2797_v18, %v2491_v17  ;;  %v2494_v6 = vadd.f32 %v5097_v47, %v6754_v31  ;;  %v5157_v28 = vpop.f32.mrf.mxu0 }
 0x1ab   : > { %v2414_v4 = vpop.f32.mrf.mxu1 }
 0x1ac   : > { %v6852_v24 = vadd.f32 %v5157_v28, %v2494_v6  ;;  %v2493_v45 = vadd.f32 %v2414_v4, %v6757_v48  ;;  %v2807_v54 = vpop.f32.mrf.mxu0 }
 0x1ad   : > { %v5100_v56 = vpop.f32.mrf.mxu1 }
 0x1ae   : > { %v6855_v16 = vadd.f32 %v2807_v54, %v2493_v45  ;;  %v2496_v59 = vadd.f32 %v5100_v56, %v6760_v23  ;;  %v5160_v10 = vpop.f32.mrf.mxu0  ;;  %v2473_v56 = vadd.f32 %v6790_v42, %v6697_v51 }
 0x1af   : > { %v2424_v53 = vpop.f32.mrf.mxu1 }
 0x1b0   : > { %v6858_v5 = vadd.f32 %v5160_v10, %v2496_v59  ;;  %v2495_v60 = vadd.f32 %v2424_v53, %v6763_v57  ;;  %v2817_v21 = vpop.f32.mrf.mxu0 }
 0x1b1   : > { %v5103_v31 = vpop.f32.mrf.mxu1 }
 0x1b2   : > { %v6861_v61 = vadd.f32 %v2817_v21, %v2495_v60  ;;  %v2498_v36 = vadd.f32 %v5103_v31, %v6766_v25  ;;  %v5163_v62 = vpop.f32.mrf.mxu0 }
 0x1b3   : > { %v2434_v48 = vpop.f32.mrf.mxu1 }
 0x1b4   : > { %v6864_v37 = vadd.f32 %v5163_v62, %v2498_v36  ;;  %v2497_v44 = vadd.f32 %v2434_v48, %v6769_v22  ;;  %v2827_v63 = vpop.f32.mrf.mxu0  ;;  %v2866_v36 = vadd.f32 %v6794_v14, %v2473_v56 }
 0x1b5   : > { %v5106_v23 = vpop.f32.mrf.mxu1 }
 0x1b6   : > { %v6867_v9 = vadd.f32 %v2827_v63, %v2497_v44  ;;  %v2500_v29 = vadd.f32 %v5106_v23, %v6772_v0  ;;  %v5166_v46 = vpop.f32.mrf.mxu0 }
 0x1b7   : > { %v2444_v57 = vpop.f32.mrf.mxu1 }
 0x1b8   : > { %v6870_v1 = vadd.f32 %v5166_v46, %v2500_v29  ;;  %v2499_v17 = vadd.f32 %v2444_v57, %v6775_v38  ;;  %v2837_v18 = vpop.f32.mrf.mxu0 }
 0x1b9   : > { %v5109_v25 = vpop.f32.mrf.mxu1 }
 0x1ba   : > { %v6873_v47 = vadd.f32 %v2837_v18, %v2499_v17  ;;  %v2502_v6 = vadd.f32 %v5109_v25, %v6778_v7  ;;  %v5169_v28 = vpop.f32.mrf.mxu0 }
 0x1bb   : > { %v2454_v22 = vpop.f32.mrf.mxu1 }
 0x1bc   : > { %v6876_v4 = vadd.f32 %v5169_v28, %v2502_v6  ;;  %v2501_v45 = vadd.f32 %v2454_v22, %v6781_v49  ;;  %v2847_v54 = vpop.f32.mrf.mxu0 }
 0x1bd   : > { %v5112_v0 = vpop.f32.mrf.mxu1 }
 0x1be   : > { %v6881_v59 = vadd.f32 %v2847_v54, %v2501_v45  ;;  %v2504_v38 = vadd.f32 %v5112_v0, %v6784_v3  ;;  %v5172_v10 = vpop.f32.mrf.mxu0 }
 0x1bf   : > { %v2464_v53 = vpop.f32.mrf.mxu1 }
 0x1c0   : > { %v6884_v60 = vadd.f32 %v5172_v10, %v2504_v38  ;;  %v2503_v7 = vadd.f32 %v2464_v53, %v6787_v43  ;;  %v2857_v21 = vpop.f32.mrf.mxu0 }
 0x1c1   : > { %v5187_v31 = vpop.f32.mrf.mxu1 }
 0x1c2   : > { %v6888_v49 = vadd.f32 %v2857_v21, %v2503_v7  ;;  %v5247_v62 = vpop.f32.mrf.mxu0  ;;  %v3259_v63 = vadd.f32 %v5187_v31, %v6792_v35 }
 0x1c3   : > { %v3099_v48 = vpop.f32.mrf.mxu1 }
 0x1c4   : > { %v3258_v44 = vadd.f32 %v3099_v48, %v2866_v36  ;;  %v3491_v51 = vpop.f32.mrf.mxu0  ;;  %v3651_v43 = vadd.f32 %v5247_v62, %v3259_v63 }
 0x1c5   : > { %v5190_v42 = vpop.f32.mrf.mxu1 }
 0x1c6   : > { %v5250_v3 = vpop.f32.mrf.mxu0  ;;  %v3650_v23 = vadd.f32 %v3491_v51, %v3258_v44  ;;  %v3261_v28 = vadd.f32 %v5190_v42, %v6797_v30 }
 0x1c7   : > { %v3109_v29 = vpop.f32.mrf.mxu1 }
 0x1c8   : > { %v3501_v46 = vpop.f32.mrf.mxu0  ;;  %3682 = vxpose.xlu0.b32.start [1/16] (narrow) %v3650_v23, 8  ;;  %v3260_v17 = vadd.f32 %v3109_v29, %v6800_v26  ;;  %v3653_v56 = vadd.f32 %v5250_v3, %v3261_v28  ;;  %v2489_v23 = vadd.f32 %v6839_v8, %v6745_v39 }
 0x1c9   : > { %v5193_v57 = vpop.f32.mrf.mxu1 }
 0x1ca   : > { %v5253_v18 = vpop.f32.mrf.mxu0  ;;  %v3652_v22 = vadd.f32 %v3501_v46, %v3260_v17  ;;  %v3263_v21 = vadd.f32 %v5193_v57, %v6803_v12 }
 0x1cb   : > { %v3119_v14 = vpop.f32.mrf.mxu1 }
 0x1cc   : > { %v3511_v25 = vpop.f32.mrf.mxu0  ;;  %3683 = vxpose.xlu0.b32.cont [2/16] (narrow) %v3651_v43, 8  ;;  %v3262_v38 = vadd.f32 %v3119_v14, %v6806_v50  ;;  %v3655_v44 = vadd.f32 %v5253_v18, %v3263_v21 }
 0x1cd   : > { %v5196_v6 = vpop.f32.mrf.mxu1 }
 0x1ce   : > { %v5256_v45 = vpop.f32.mrf.mxu0  ;;  %v3654_v31 = vadd.f32 %v3511_v25, %v3262_v38  ;;  %v3265_v12 = vadd.f32 %v5196_v6, %v6809_v27 }
 0x1cf   : > { %v3129_v54 = vpop.f32.mrf.mxu1 }
 0x1d0   : > { %v3521_v35 = vpop.f32.mrf.mxu0  ;;  %3684 = vxpose.xlu0.b32.cont [3/16] (narrow) %v3652_v22, 8  ;;  %v3264_v51 = vadd.f32 %v3129_v54, %v6812_v55  ;;  %v2882_v55 = vadd.f32 %v6843_v13, %v2489_v23  ;;  %v3657_v18 = vadd.f32 %v5256_v45, %v3265_v12 }
 0x1d1   : > { %v5199_v0 = vpop.f32.mrf.mxu1 }
 0x1d2   : > { %v5259_v10 = vpop.f32.mrf.mxu0  ;;  %v3656_v29 = vadd.f32 %v3521_v35, %v3264_v51  ;;  %v3267_v27 = vadd.f32 %v5199_v0, %v6815_v11 }
 0x1d3   : > { %v3139_v53 = vpop.f32.mrf.mxu1 }
 0x1d4   : > { %v3531_v7 = vpop.f32.mrf.mxu0  ;;  %3685 = vxpose.xlu0.b32.cont [4/16] (narrow) %v3653_v56, 8  ;;  %v3266_v14 = vadd.f32 %v3139_v53, %v6818_v20  ;;  %v3659_v13 = vadd.f32 %v5259_v10, %v3267_v27 }
 0x1d5   : > { %v5202_v26 = vpop.f32.mrf.mxu1 }
 0x1d6   : > { %v5262_v36 = vpop.f32.mrf.mxu0  ;;  %v3658_v8 = vadd.f32 %v3531_v7, %v3266_v14  ;;  %v3269_v11 = vadd.f32 %v5202_v26, %v6821_v33 }
 0x1d7   : > { %v3149_v62 = vpop.f32.mrf.mxu1 }
 0x1d8   : > { %v3541_v30 = vpop.f32.mrf.mxu0  ;;  %3686 = vxpose.xlu0.b32.cont [5/16] (narrow) %v3654_v31, 8  ;;  %v3268_v45 = vadd.f32 %v3149_v62, %v6824_v2  ;;  %v3661_v10 = vadd.f32 %v5262_v36, %v3269_v11 }
 0x1d9   : > { %v5205_v48 = vpop.f32.mrf.mxu1 }
 0x1da   : > { %v5265_v42 = vpop.f32.mrf.mxu0  ;;  %v3660_v0 = vadd.f32 %v3541_v30, %v3268_v45  ;;  %v3271_v33 = vadd.f32 %v5205_v48, %v6827_v34 }
 0x1db   : > { %v3159_v63 = vpop.f32.mrf.mxu1 }
 0x1dc   : > { %v3551_v3 = vpop.f32.mrf.mxu0  ;;  %3687 = vxpose.xlu0.b32.cont [6/16] (narrow) %v3655_v44, 8  ;;  %v3270_v2 = vadd.f32 %v3159_v63, %v6830_v15  ;;  %v3663_v36 = vadd.f32 %v5265_v42, %v3271_v33 }
 0x1dd   : > { %v6896_v50 = vpop.f32.mrf.mxu1 }
 0x1de   : > { %v6901_v46 = vpop.f32.mrf.mxu0  ;;  %v3662_v26 = vadd.f32 %v3551_v3, %v3270_v2  ;;  %v3273_v34 = vadd.f32 %v6896_v50, %v6833_v58 }
 0x1df   : > { %v3169_v57 = vpop.f32.mrf.mxu1 }
 0x1e0   : > { %v3561_v43 = vpop.f32.mrf.mxu0  ;;  %3688 = vxpose.xlu0.b32.cont [7/16] (narrow) %v3656_v29, 8  ;;  %v3272_v15 = vadd.f32 %v3169_v57, %v6836_v41  ;;  %v3665_v41 = vadd.f32 %v6901_v46, %v3273_v34 }
 0x1e1   : > { %v5211_v17 = vpop.f32.mrf.mxu1 }
 0x1e2   : > { %v5271_v25 = vpop.f32.mrf.mxu0  ;;  %v3275_v6 = vadd.f32 %v5211_v17, %v6841_v40  ;;  %v3664_v48 = vadd.f32 %v3561_v43, %v3272_v15 }
 0x1e3   : > { %v3179_v28 = vpop.f32.mrf.mxu1 }
 0x1e4   : > { %v3274_v22 = vadd.f32 %v3179_v28, %v2882_v55  ;;  %3689 = vxpose.xlu0.b32.cont [8/16] (narrow) %v3657_v18, 8  ;;  %v3571_v54 = vpop.f32.mrf.mxu0  ;;  %v3667_v20 = vadd.f32 %v5271_v25, %v3275_v6 }
 0x1e5   : > { %v5214_v39 = vpop.f32.mrf.mxu1 }
 0x1e6   : > { %v3666_v35 = vadd.f32 %v3571_v54, %v3274_v22  ;;  %v5274_v38 = vpop.f32.mrf.mxu0  ;;  %v3277_v40 = vadd.f32 %v5214_v39, %v6846_v32 }
 0x1e7   : > { %v3189_v56 = vpop.f32.mrf.mxu1 }
 0x1e8   : > { %3714 = vxpose.xlu1.b32.start [1/16] (narrow) %v3666_v35, 8  ;;  %3690 = vxpose.xlu0.b32.cont [9/16] (narrow) %v3658_v8, 8  ;;  %v3276_v53 = vadd.f32 %v3189_v56, %v6849_v52  ;;  %v3581_v31 = vpop.f32.mrf.mxu0  ;;  %v3669_v62 = vadd.f32 %v5274_v38, %v3277_v40 }
 0x1e9   : > { %v5217_v21 = vpop.f32.mrf.mxu1 }
 0x1ea   : > { %v3668_v7 = vadd.f32 %v3581_v31, %v3276_v53  ;;  %v5277_v51 = vpop.f32.mrf.mxu0  ;;  %v3279_v32 = vadd.f32 %v5217_v21, %v6852_v24 }
 0x1eb   : > { %v3199_v44 = vpop.f32.mrf.mxu1 }
 0x1ec   : > { %3715 = vxpose.xlu1.b32.cont [2/16] (narrow) %v3667_v20, 8  ;;  %3691 = vxpose.xlu0.b32.cont [10/16] (narrow) %v3659_v13, 8  ;;  %v3278_v52 = vadd.f32 %v3199_v44, %v6855_v16  ;;  %v3591_v12 = vpop.f32.mrf.mxu0  ;;  %v3671_v63 = vadd.f32 %v5277_v51, %v3279_v32 }
 0x1ed   : > { %v5220_v23 = vpop.f32.mrf.mxu1 }
 0x1ee   : > { %v3670_v30 = vadd.f32 %v3591_v12, %v3278_v52  ;;  %v5280_v17 = vpop.f32.mrf.mxu0  ;;  %v3281_v24 = vadd.f32 %v5220_v23, %v6858_v5 }
 0x1ef   : > { %v3209_v29 = vpop.f32.mrf.mxu1 }
 0x1f0   : > { %3716 = vxpose.xlu1.b32.cont [3/16] (narrow) %v3668_v7, 8  ;;  %3692 = vxpose.xlu0.b32.cont [11/16] (narrow) %v3660_v0, 8  ;;  %v3280_v16 = vadd.f32 %v3209_v29, %v6861_v61  ;;  %v3601_v18 = vpop.f32.mrf.mxu0  ;;  %v3673_v42 = vadd.f32 %v5280_v17, %v3281_v24 }
 0x1f1   : > { %v5223_v55 = vpop.f32.mrf.mxu1 }
 0x1f2   : > { %v3672_v3 = vadd.f32 %v3601_v18, %v3280_v16  ;;  %v5283_v25 = vpop.f32.mrf.mxu0  ;;  %v3283_v22 = vadd.f32 %v5223_v55, %v6864_v37 }
 0x1f3   : > { %v3219_v14 = vpop.f32.mrf.mxu1 }
 0x1f4   : > { %3717 = vxpose.xlu1.b32.cont [4/16] (narrow) %v3669_v62, 8  ;;  %3693 = vxpose.xlu0.b32.cont [12/16] (narrow) %v3661_v10, 8  ;;  %v3282_v61 = vadd.f32 %v3219_v14, %v6867_v9  ;;  %v3611_v28 = vpop.f32.mrf.mxu0  ;;  %v3675_v5 = vadd.f32 %v5283_v25, %v3283_v22 }
 0x1f5   : > { %v5226_v57 = vpop.f32.mrf.mxu1 }
 0x1f6   : > { %v3674_v58 = vadd.f32 %v3611_v28, %v3282_v61  ;;  %v5286_v43 = vpop.f32.mrf.mxu0  ;;  %v3285_v46 = vadd.f32 %v5226_v57, %v6870_v1 }
 0x1f7   : > { %v3229_v50 = vpop.f32.mrf.mxu1 }
 0x1f8   : > { %3718 = vxpose.xlu1.b32.cont [5/16] (narrow) %v3670_v30, 8  ;;  %3694 = vxpose.xlu0.b32.cont [13/16] (narrow) %v3662_v26, 8  ;;  %v3284_v54 = vadd.f32 %v3229_v50, %v6873_v47  ;;  %v3621_v27 = vpop.f32.mrf.mxu0  ;;  %v3677_v35 = vadd.f32 %v5286_v43, %v3285_v46 }
 0x1f9   : > { %v5229_v39 = vpop.f32.mrf.mxu1 }
 0x1fa   : > { %v3676_v8 = vadd.f32 %v3621_v27, %v3284_v54  ;;  %v5289_v6 = vpop.f32.mrf.mxu0  ;;  %v3287_v13 = vadd.f32 %v5229_v39, %v6876_v4  ;;  %v3750_v4 = vpop.permute.xlu1 %3749 }
 0x1fb   : > { %v3239_v9 = vpop.f32.mrf.mxu1 }
 0x1fc   : > { %3719 = vxpose.xlu1.b32.cont [6/16] (narrow) %v3671_v63, 8  ;;  %3695 = vxpose.xlu0.b32.cont [14/16] (narrow) %v3663_v36, 8  ;;  %v3286_v56 = vadd.f32 %v3239_v9, %v6881_v59  ;;  %v3631_v38 = vpop.f32.mrf.mxu0  ;;  %v3679_v53 = vadd.f32 %v5289_v6, %v3287_v13 }
 0x1fd   : > { %v5232_v37 = vpop.f32.mrf.mxu1 }
 0x1fe   : > { %v3678_v47 = vadd.f32 %v3631_v38, %v3286_v56  ;;  %v5292_v20 = vpop.f32.mrf.mxu0  ;;  %v3289_v31 = vadd.f32 %v5232_v37, %v6884_v60 }
 0x1ff   : > { %v3249_v45 = vpop.f32.mrf.mxu1 }
 0x200   : > { %3720 = vxpose.xlu1.b32.cont [7/16] (narrow) %v3672_v3, 8  ;;  %3696 = vxpose.xlu0.b32.cont [15/16] (narrow) %v3664_v48, 8  ;;  %v3288_v1 = vadd.f32 %v3249_v45, %v6888_v49  ;;  %v3641_v21 = vpop.f32.mrf.mxu0  ;;  %v3681_v59 = vadd.f32 %v5292_v20, %v3289_v31  ;;  %v4402_v49 = vld.sshfl [vmem:[%s215_s13] sm:$0x33 pattern:$0x76325410] }
 0x201   : > { %v3763_v60 = vcombine.high %v4402_v49, %v4402_v49 }
 0x202   : > { %v3680_v11 = vadd.f32 %v3641_v21, %v3288_v1 }
 0x204   : > { %3721 = vxpose.xlu1.b32.cont [8/16] (narrow) %v3673_v42, 8  ;;  %3697 = vxpose.xlu0.b32.end [16/16] (narrow) %v3665_v41, 8 }
 0x208   : > { %3722 = vxpose.xlu1.b32.cont [9/16] (narrow) %v3674_v58, 8 }
 0x20c   : > { %3723 = vxpose.xlu1.b32.cont [10/16] (narrow) %v3675_v5, 8 }
 0x210   : > { %3724 = vxpose.xlu1.b32.cont [11/16] (narrow) %v3676_v8, 8 }
 0x214   : > { %3725 = vxpose.xlu1.b32.cont [12/16] (narrow) %v3677_v35, 8 }
 0x218   : > { %3726 = vxpose.xlu1.b32.cont [13/16] (narrow) %v3678_v47, 8 }
 0x21c   : > { %3727 = vxpose.xlu1.b32.cont [14/16] (narrow) %v3679_v53, 8 }
 0x220   : > { %3728 = vxpose.xlu1.b32.cont [15/16] (narrow) %v3680_v11, 8 }
 0x224   : > { %3729 = vxpose.xlu1.b32.end [16/16] (narrow) %v3681_v59, 8 }
 0x22d   : > { %5347 = vset.pattern.permute.xlu0 %v5410_v19 }
 0x244   : > { %v3698_v0 = vpop.trf.xlu0 }
 0x245   : > { %v3752_v40 = vadd.f32 %v3750_v4, %v3698_v0 }
 0x247   : > { %v3766_v51 = vadd.f32 %v4402_v49, %v3752_v40 }
 0x264   : > { %v3730_v7 = vpop.trf.xlu1 }
 0x265   : > { %v3753_v44 = vadd.f32 %v3750_v4, %v3730_v7 }
 0x267   : > { %v3767_v19 = vadd.f32 %v3763_v60, %v3753_v44 }
 0x269   : > { %v3770_v10 = vcombine.low %v3766_v51, %v3767_v19 }
 0x26b   : > { %4403 = vst.sshfl [vmem:[%s205_s23] sm:$0x33 pattern:$0x76325410] %v3770_v10 }
 0x26c   : > { %5361 = shalt.err (!%p5358_p3)
}
 0x26d   : > { %s5362_s8 = scalar_lea.hbm %s3793_s29, 64  ;;  %s5366_s11 = scalar_lea.hbm %s6972_s4, 128 }
 0x26e   : > { %p5363_p4 = scmp.ne.s32.totalorder %s3793_s29, %s5362_s8  ;;  %p5367_p9 = scmp.lt.s32.totalorder %s3793_s29, %s6972_s4 }
 0x26f   : > { %p5368_p10 = scmp.lt.s32.totalorder %s5366_s11, %s5362_s8 }
 0x270   : > { %p5364_p7 = pnand %p5363_p4, %p5475_p5 }
 0x271   : > { %p5369_p11 = por %p5368_p10, %p5367_p9 }
 0x272   : > { %p5365_p8 = pneg %p5364_p7 }
 0x274   : > { %p5370_p12 = pnand %p5369_p11, %p5365_p8 }
 0x276   : > { %5373 = shalt.err (!%p5370_p12)
}
 0x277   : > { %5306 = dma.vmem_to_hbm [thread:$0]  (%p5475_p5), %s3796_s27, 64, %s3793_s29, %s3781_s30  }
 0x278 PF: > { %p5312_p13 = scmp.ge.s32.totalorder %s5408_s18, 2  ;;  %s3807_s14 = sand.u32 1, %s5396_s15  }
 0x279   : > { %s3808_s22 = scalar_lea.sflag [#allocation3], %s3807_s14 }
 0x27a   : > { %p5309_p0 = pnand %p5312_p13, %p5479_p6 }
 0x27c   : > { %p5310_p1 = pneg %p5309_p0 }
 0x27e   : > { %5391 = dma.done.wait (%p5310_p1), %s3808_s22, 64  }
 0x27f   : > { %5393 = vsyncadd (%p5310_p1), %s3808_s22, 4294967232  ;;  %p14_p2 = scmp.ge.s32.totalorder %s5462_s21, 4   ;;  %s7069_s15 = smov %s5400_s16 }
 0x280   : > { %s7070_s16 = smov %s5404_s17  ;;  %s7071_s17 = smov %s5473_s24 }
 0x281   : > { %s7072_s18 = smov %s5462_s21  ;;  %16 = sbr.rel (!%p14_p2) target bundleno = 3 (0x3), region = 84 }
 0x286   :  { %3813 = vsyncpa [#allocation3], 1 }
 0x287   :  { %3815 = vsyncpa [#allocation3 + $0x1], 1 }

</bundles_post_ra>
